<compile_context>
chip_gen: v7x
topology: tpu7x:2x2x1
jax: 0.10.0
libtpu: 0.0.40
codegen_flags: <defaults>
</compile_context>

<pallas_src>
import math
from functools import partial

import jax
import jax.numpy as jnp
from jax.experimental import pallas as pl
from jax.experimental.pallas import tpu as pltpu


_SQRT_HALF = 0.7071067811865476


def _erf_approx(z):
    # Abramowitz & Stegun 7.1.26 rational approximation, |abs err| <= 1.5e-7.
    # Built only from exp / mul / add / where so it lowers cleanly in Mosaic on all
    # TPU generations; matches nn.GELU()'s exact-erf variant to float32 noise level.
    a1, a2, a3, a4, a5 = 0.254829592, -0.284496736, 1.421413741, -1.453152027, 1.061405429
    p = 0.3275911
    az = jnp.abs(z)
    t = 1.0 / (1.0 + p * az)
    poly = ((((a5 * t + a4) * t + a3) * t + a2) * t + a1) * t
    y = 1.0 - poly * jnp.exp(-az * az)
    return jnp.where(z < 0.0, -y, y)


def _gelu(x):
    # PyTorch nn.GELU() default = exact (erf) variant.
    return 0.5 * x * (1.0 + _erf_approx(x * _SQRT_HALF))


# --------------------------------------------------------------------------------------
# Fused EdgeConv2 kernel: (conv1x1 + folded-BN + GELU) x 3 on one row tile
# --------------------------------------------------------------------------------------

def _edgeconv2_kernel(x_ref, w1_ref, b1_ref, w2_ref, b2_ref, w3_ref, b3_ref, o_ref):
    # x_ref: (TM, F_in) row tile.  Weight/bias blocks have a constant block index across
    # the grid, so they are fetched into VMEM once and stay resident.
    h = jnp.dot(x_ref[...], w1_ref[...], preferred_element_type=jnp.float32) + b1_ref[...]
    h = _gelu(h)
    h = jnp.dot(h, w2_ref[...], preferred_element_type=jnp.float32) + b2_ref[...]
    h = _gelu(h)
    h = jnp.dot(h, w3_ref[...], preferred_element_type=jnp.float32) + b3_ref[...]
    o_ref[...] = _gelu(h)


def fold_bn_into_conv(params, eps=1e-5):
    """One-time parameter prep: fold eval-mode BatchNorm into the bias-free 1x1 conv.

    y = BN(x @ W^T) = (x @ W^T) * s + t,  s = gamma/sqrt(var+eps),  t = beta - mean*s
    => W' = (W * s[:, None])^T  (pre-transposed to (in, out)),  b' = t.
    """
    def fold_one(w, bn):
        s = bn['gamma'] / jnp.sqrt(bn['var'] + eps)
        wt = (w * s[:, None]).T.astype(jnp.float32)                  # (in, out)
        b = (bn['beta'] - bn['mean'] * s).reshape(1, -1).astype(jnp.float32)
        return wt, b

    w1, b1 = fold_one(params['w1'], params['bn1'])
    w2, b2 = fold_one(params['w2'], params['bn2'])
    w3, b3 = fold_one(params['w3'], params['bn3'])
    return dict(w1=w1, b1=b1, w2=w2, b2=b2, w3=w3, b3=b3)


def edgeconv2_forward(x, fp, *, tile_m=256):
    """x: (B, N, F_in) -> (B, C_out, N)  (same output layout as the PyTorch module)."""
    B, N, F_in = x.shape
    C = fp['w1'].shape[1]

    M = B * N
    x2 = x.reshape(M, F_in).astype(jnp.float32)

    tm = min(tile_m, M)
    tm = ((tm + 7) // 8) * 8                     # sublane-aligned row tile
    Mp = pl.cdiv(M, tm) * tm
    if Mp != M:                                  # pad rows; junk rows sliced off below
        x2 = jnp.pad(x2, ((0, Mp - M), (0, 0)))

    y = pl.pallas_call(
        _edgeconv2_kernel,
        grid=(Mp // tm,),
        in_specs=[
            pl.BlockSpec((tm, F_in), lambda i: (i, 0)),   # activations: tiled over rows
            pl.BlockSpec((F_in, C), lambda i: (0, 0)),    # w1 (resident)
            pl.BlockSpec((1, C), lambda i: (0, 0)),       # b1
            pl.BlockSpec((C, C), lambda i: (0, 0)),       # w2
            pl.BlockSpec((1, C), lambda i: (0, 0)),       # b2
            pl.BlockSpec((C, C), lambda i: (0, 0)),       # w3
            pl.BlockSpec((1, C), lambda i: (0, 0)),       # b3
        ],
        out_specs=pl.BlockSpec((tm, C), lambda i: (i, 0)),
        out_shape=jax.ShapeDtypeStruct((Mp, C), jnp.float32),
        compiler_params=pltpu.CompilerParams(dimension_semantics=("parallel",)),
    )(x2, fp['w1'], fp['b1'], fp['w2'], fp['b2'], fp['w3'], fp['b3'])

    y = y[:M].reshape(B, N, C)
    return jnp.transpose(y, (0, 2, 1))           # (B, C_out, N) like torch.mean(..., dim=3)


# --------------------------------------------------------------------------------------
# Faithful (un-optimized) JAX port of the PyTorch forward, for verification
# --------------------------------------------------------------------------------------

def edgeconv2_reference(x, params, num_neighbors, eps=1e-5):
    B, N, F = x.shape
    d = jnp.sum((x[:, :, None, :] - x[:, None, :, :]) ** 2, axis=-1)      # (B, N, N)
    _, idx = jax.lax.top_k(-d, num_neighbors)                             # k smallest dists
    nb = jnp.broadcast_to(x[:, :, None, :], (B, N, N, F))
    idx = jnp.broadcast_to(idx[..., None], (B, N, num_neighbors, F))
    nb = jnp.take_along_axis(nb, idx, axis=2)                             # (B, N, k, F)

    def block(h, w, bn):
        y = jnp.einsum('bnkf,cf->bnkc', h, w,
                       precision=jax.lax.Precision.HIGHEST)               # 1x1 conv, no bias
        y = (y - bn['mean']) / jnp.sqrt(bn['var'] + eps) * bn['gamma'] + bn['beta']
        return jax.nn.gelu(y, approximate=False)

    h = block(nb, params['w1'], params['bn1'])
    h = block(h, params['w2'], params['bn2'])
    h = block(h, params['w3'], params['bn3'])
    return jnp.transpose(jnp.mean(h, axis=2), (0, 2, 1))                  # (B, C, N)


# --------------------------------------------------------------------------------------
# Deterministic parameter initialization (PyTorch layout: conv weight (out, in))
# --------------------------------------------------------------------------------------

def make_params(key, in_channels, out_channels):
    ks = iter(jax.random.split(key, 16))

    def nrm(shape, scale=0.1):
        return scale * jax.random.normal(next(ks), shape, jnp.float32)

    def bn_p(c):
        return dict(gamma=1.0 + nrm((c,)), beta=nrm((c,)),
                    mean=nrm((c,)), var=0.5 + jnp.abs(nrm((c,))))

    return dict(
        w1=nrm((out_channels, in_channels)), bn1=bn_p(out_channels),
        w2=nrm((out_channels, out_channels)), bn2=bn_p(out_channels),
        w3=nrm((out_channels, out_channels)), bn3=bn_p(out_channels),
    )


# --------------------------------------------------------------------------------------

if __name__ == "__main__":
    key = jax.random.PRNGKey(0)
    kx, kp = jax.random.split(key)

    # EdgeConv2(in_channels=128, out_channels=64, num_neighbors=20), as used in MyModel.
    B, N, F_IN, C_OUT, K = 2, 64, 128, 64, 20
    x = jax.random.normal(kx, (B, N, F_IN), jnp.float32)
    params = make_params(kp, F_IN, C_OUT)

    folded = fold_bn_into_conv(params)           # one-time prep: BN folded, weights W^T
    fwd = jax.jit(edgeconv2_forward)
    out = jax.block_until_ready(fwd(x, folded))

    assert out.shape == (B, C_OUT, N), out.shape
    assert bool(jnp.all(jnp.isfinite(out)))

    # Verify against the faithful (topk + gather + per-neighbor conv stack) reference.
    ref = jax.block_until_ready(
        jax.jit(partial(edgeconv2_reference, num_neighbors=K))(x, params))
    assert bool(jnp.allclose(out, ref, atol=2e-3, rtol=2e-3)), \
        float(jnp.max(jnp.abs(out - ref)))

    print("KERNEL_OK")
</pallas_src>

<mosaic_0001>
module attributes {stable_mosaic.version = 11 : i64} {
  func.func @_edgeconv2_kernel(%arg0: i32, %arg1: memref<128x128xf32, #tpu.memory_space<vmem>>, %arg2: memref<128x64xf32, #tpu.memory_space<vmem>>, %arg3: memref<1x64xf32, #tpu.memory_space<vmem>>, %arg4: memref<64x64xf32, #tpu.memory_space<vmem>>, %arg5: memref<1x64xf32, #tpu.memory_space<vmem>>, %arg6: memref<64x64xf32, #tpu.memory_space<vmem>>, %arg7: memref<1x64xf32, #tpu.memory_space<vmem>>, %arg8: memref<128x64xf32, #tpu.memory_space<vmem>>) attributes {dimension_semantics = [#tpu.dimension_semantics<parallel>], iteration_bounds = array<i64: 1>, scalar_prefetch = 0 : i64, scratch_operands = 0 : i64, tpu.core_type = #tpu.core_type<tc>, window_params = [{transform_indices = @transform_0, window_bounds = array<i64: 128, 128>}, {pipeline_mode = #tpu.pipeline_mode<synchronous>, transform_indices = @transform_1, window_bounds = array<i64: 128, 64>}, {pipeline_mode = #tpu.pipeline_mode<synchronous>, transform_indices = @transform_2, window_bounds = array<i64: 1, 64>}, {pipeline_mode = #tpu.pipeline_mode<synchronous>, transform_indices = @transform_3, window_bounds = array<i64: 64, 64>}, {pipeline_mode = #tpu.pipeline_mode<synchronous>, transform_indices = @transform_4, window_bounds = array<i64: 1, 64>}, {pipeline_mode = #tpu.pipeline_mode<synchronous>, transform_indices = @transform_5, window_bounds = array<i64: 64, 64>}, {pipeline_mode = #tpu.pipeline_mode<synchronous>, transform_indices = @transform_6, window_bounds = array<i64: 1, 64>}, {transform_indices = @transform_7, window_bounds = array<i64: 128, 64>}]} {
    %c0 = arith.constant 0 : index
    %c0_0 = arith.constant 0 : index
    %0 = vector.load %arg1[%c0, %c0_0] : memref<128x128xf32, #tpu.memory_space<vmem>>, vector<128x128xf32>
    %c0_1 = arith.constant 0 : index
    %c0_2 = arith.constant 0 : index
    %1 = vector.load %arg2[%c0_1, %c0_2] : memref<128x64xf32, #tpu.memory_space<vmem>>, vector<128x64xf32>
    %cst = arith.constant dense<0.000000e+00> : vector<128x64xf32>
    %2 = tpu.matmul %0, %1, %cst {dimension_numbers = #tpu.dot_dimension_numbers<[1], [0], [0], [1], [0, 0, 1, 1], [], []>} : vector<128x128xf32>, vector<128x64xf32>, vector<128x64xf32> -> vector<128x64xf32>
    %c0_3 = arith.constant 0 : index
    %c0_4 = arith.constant 0 : index
    %3 = vector.load %arg3[%c0_3, %c0_4] : memref<1x64xf32, #tpu.memory_space<vmem>>, vector<1x64xf32>
    %4 = vector.broadcast %3 : vector<1x64xf32> to vector<128x64xf32>
    %5 = arith.addf %2, %4 : vector<128x64xf32>
    %cst_5 = arith.constant 5.000000e-01 : f32
    %6 = vector.broadcast %cst_5 : f32 to vector<128x64xf32>
    %7 = arith.mulf %6, %5 : vector<128x64xf32>
    %cst_6 = arith.constant 0.707106769 : f32
    %8 = vector.broadcast %cst_6 : f32 to vector<128x64xf32>
    %9 = arith.mulf %5, %8 : vector<128x64xf32>
    %10 = math.absf %9 : vector<128x64xf32>
    %cst_7 = arith.constant 0.327591091 : f32
    %11 = vector.broadcast %cst_7 : f32 to vector<128x64xf32>
    %12 = arith.mulf %11, %10 : vector<128x64xf32>
    %cst_8 = arith.constant 1.000000e+00 : f32
    %13 = vector.broadcast %cst_8 : f32 to vector<128x64xf32>
    %14 = arith.addf %13, %12 : vector<128x64xf32>
    %cst_9 = arith.constant 1.000000e+00 : f32
    %15 = vector.broadcast %cst_9 : f32 to vector<128x64xf32>
    %16 = arith.divf %15, %14 : vector<128x64xf32>
    %cst_10 = arith.constant 1.06140542 : f32
    %17 = vector.broadcast %cst_10 : f32 to vector<128x64xf32>
    %18 = arith.mulf %17, %16 : vector<128x64xf32>
    %cst_11 = arith.constant -1.45315206 : f32
    %19 = vector.broadcast %cst_11 : f32 to vector<128x64xf32>
    %20 = arith.addf %18, %19 : vector<128x64xf32>
    %21 = arith.mulf %20, %16 : vector<128x64xf32>
    %cst_12 = arith.constant 1.42141378 : f32
    %22 = vector.broadcast %cst_12 : f32 to vector<128x64xf32>
    %23 = arith.addf %21, %22 : vector<128x64xf32>
    %24 = arith.mulf %23, %16 : vector<128x64xf32>
    %cst_13 = arith.constant -0.284496725 : f32
    %25 = vector.broadcast %cst_13 : f32 to vector<128x64xf32>
    %26 = arith.addf %24, %25 : vector<128x64xf32>
    %27 = arith.mulf %26, %16 : vector<128x64xf32>
    %cst_14 = arith.constant 0.254829586 : f32
    %28 = vector.broadcast %cst_14 : f32 to vector<128x64xf32>
    %29 = arith.addf %27, %28 : vector<128x64xf32>
    %30 = arith.mulf %29, %16 : vector<128x64xf32>
    %cst_15 = arith.constant 0.000000e+00 : f32
    %31 = vector.broadcast %cst_15 : f32 to vector<128x64xf32>
    %32 = arith.subf %31, %10 : vector<128x64xf32>
    %33 = arith.mulf %32, %10 : vector<128x64xf32>
    %34 = math.exp %33 : vector<128x64xf32>
    %35 = arith.mulf %30, %34 : vector<128x64xf32>
    %cst_16 = arith.constant 1.000000e+00 : f32
    %36 = vector.broadcast %cst_16 : f32 to vector<128x64xf32>
    %37 = arith.subf %36, %35 : vector<128x64xf32>
    %cst_17 = arith.constant 0.000000e+00 : f32
    %38 = vector.broadcast %cst_17 : f32 to vector<128x64xf32>
    %39 = arith.cmpf olt, %9, %38 : vector<128x64xf32>
    %cst_18 = arith.constant 0.000000e+00 : f32
    %40 = vector.broadcast %cst_18 : f32 to vector<128x64xf32>
    %41 = arith.subf %40, %37 : vector<128x64xf32>
    %42 = arith.select %39, %41, %37 : vector<128x64xi1>, vector<128x64xf32>
    %cst_19 = arith.constant 1.000000e+00 : f32
    %43 = vector.broadcast %cst_19 : f32 to vector<128x64xf32>
    %44 = arith.addf %43, %42 : vector<128x64xf32>
    %45 = arith.mulf %7, %44 : vector<128x64xf32>
    %c0_20 = arith.constant 0 : index
    %c0_21 = arith.constant 0 : index
    %46 = vector.load %arg4[%c0_20, %c0_21] : memref<64x64xf32, #tpu.memory_space<vmem>>, vector<64x64xf32>
    %cst_22 = arith.constant dense<0.000000e+00> : vector<128x64xf32>
    %47 = tpu.matmul %45, %46, %cst_22 {dimension_numbers = #tpu.dot_dimension_numbers<[1], [0], [0], [1], [0, 0, 1, 1], [], []>} : vector<128x64xf32>, vector<64x64xf32>, vector<128x64xf32> -> vector<128x64xf32>
    %c0_23 = arith.constant 0 : index
    %c0_24 = arith.constant 0 : index
    %48 = vector.load %arg5[%c0_23, %c0_24] : memref<1x64xf32, #tpu.memory_space<vmem>>, vector<1x64xf32>
    %49 = vector.broadcast %48 : vector<1x64xf32> to vector<128x64xf32>
    %50 = arith.addf %47, %49 : vector<128x64xf32>
    %cst_25 = arith.constant 5.000000e-01 : f32
    %51 = vector.broadcast %cst_25 : f32 to vector<128x64xf32>
    %52 = arith.mulf %51, %50 : vector<128x64xf32>
    %cst_26 = arith.constant 0.707106769 : f32
    %53 = vector.broadcast %cst_26 : f32 to vector<128x64xf32>
    %54 = arith.mulf %50, %53 : vector<128x64xf32>
    %55 = math.absf %54 : vector<128x64xf32>
    %cst_27 = arith.constant 0.327591091 : f32
    %56 = vector.broadcast %cst_27 : f32 to vector<128x64xf32>
    %57 = arith.mulf %56, %55 : vector<128x64xf32>
    %cst_28 = arith.constant 1.000000e+00 : f32
    %58 = vector.broadcast %cst_28 : f32 to vector<128x64xf32>
    %59 = arith.addf %58, %57 : vector<128x64xf32>
    %cst_29 = arith.constant 1.000000e+00 : f32
    %60 = vector.broadcast %cst_29 : f32 to vector<128x64xf32>
    %61 = arith.divf %60, %59 : vector<128x64xf32>
    %cst_30 = arith.constant 1.06140542 : f32
    %62 = vector.broadcast %cst_30 : f32 to vector<128x64xf32>
    %63 = arith.mulf %62, %61 : vector<128x64xf32>
    %cst_31 = arith.constant -1.45315206 : f32
    %64 = vector.broadcast %cst_31 : f32 to vector<128x64xf32>
    %65 = arith.addf %63, %64 : vector<128x64xf32>
    %66 = arith.mulf %65, %61 : vector<128x64xf32>
    %cst_32 = arith.constant 1.42141378 : f32
    %67 = vector.broadcast %cst_32 : f32 to vector<128x64xf32>
    %68 = arith.addf %66, %67 : vector<128x64xf32>
    %69 = arith.mulf %68, %61 : vector<128x64xf32>
    %cst_33 = arith.constant -0.284496725 : f32
    %70 = vector.broadcast %cst_33 : f32 to vector<128x64xf32>
    %71 = arith.addf %69, %70 : vector<128x64xf32>
    %72 = arith.mulf %71, %61 : vector<128x64xf32>
    %cst_34 = arith.constant 0.254829586 : f32
    %73 = vector.broadcast %cst_34 : f32 to vector<128x64xf32>
    %74 = arith.addf %72, %73 : vector<128x64xf32>
    %75 = arith.mulf %74, %61 : vector<128x64xf32>
    %cst_35 = arith.constant 0.000000e+00 : f32
    %76 = vector.broadcast %cst_35 : f32 to vector<128x64xf32>
    %77 = arith.subf %76, %55 : vector<128x64xf32>
    %78 = arith.mulf %77, %55 : vector<128x64xf32>
    %79 = math.exp %78 : vector<128x64xf32>
    %80 = arith.mulf %75, %79 : vector<128x64xf32>
    %cst_36 = arith.constant 1.000000e+00 : f32
    %81 = vector.broadcast %cst_36 : f32 to vector<128x64xf32>
    %82 = arith.subf %81, %80 : vector<128x64xf32>
    %cst_37 = arith.constant 0.000000e+00 : f32
    %83 = vector.broadcast %cst_37 : f32 to vector<128x64xf32>
    %84 = arith.cmpf olt, %54, %83 : vector<128x64xf32>
    %cst_38 = arith.constant 0.000000e+00 : f32
    %85 = vector.broadcast %cst_38 : f32 to vector<128x64xf32>
    %86 = arith.subf %85, %82 : vector<128x64xf32>
    %87 = arith.select %84, %86, %82 : vector<128x64xi1>, vector<128x64xf32>
    %cst_39 = arith.constant 1.000000e+00 : f32
    %88 = vector.broadcast %cst_39 : f32 to vector<128x64xf32>
    %89 = arith.addf %88, %87 : vector<128x64xf32>
    %90 = arith.mulf %52, %89 : vector<128x64xf32>
    %c0_40 = arith.constant 0 : index
    %c0_41 = arith.constant 0 : index
    %91 = vector.load %arg6[%c0_40, %c0_41] : memref<64x64xf32, #tpu.memory_space<vmem>>, vector<64x64xf32>
    %cst_42 = arith.constant dense<0.000000e+00> : vector<128x64xf32>
    %92 = tpu.matmul %90, %91, %cst_42 {dimension_numbers = #tpu.dot_dimension_numbers<[1], [0], [0], [1], [0, 0, 1, 1], [], []>} : vector<128x64xf32>, vector<64x64xf32>, vector<128x64xf32> -> vector<128x64xf32>
    %c0_43 = arith.constant 0 : index
    %c0_44 = arith.constant 0 : index
    %93 = vector.load %arg7[%c0_43, %c0_44] : memref<1x64xf32, #tpu.memory_space<vmem>>, vector<1x64xf32>
    %94 = vector.broadcast %93 : vector<1x64xf32> to vector<128x64xf32>
    %95 = arith.addf %92, %94 : vector<128x64xf32>
    %cst_45 = arith.constant 5.000000e-01 : f32
    %96 = vector.broadcast %cst_45 : f32 to vector<128x64xf32>
    %97 = arith.mulf %96, %95 : vector<128x64xf32>
    %cst_46 = arith.constant 0.707106769 : f32
    %98 = vector.broadcast %cst_46 : f32 to vector<128x64xf32>
    %99 = arith.mulf %95, %98 : vector<128x64xf32>
    %100 = math.absf %99 : vector<128x64xf32>
    %cst_47 = arith.constant 0.327591091 : f32
    %101 = vector.broadcast %cst_47 : f32 to vector<128x64xf32>
    %102 = arith.mulf %101, %100 : vector<128x64xf32>
    %cst_48 = arith.constant 1.000000e+00 : f32
    %103 = vector.broadcast %cst_48 : f32 to vector<128x64xf32>
    %104 = arith.addf %103, %102 : vector<128x64xf32>
    %cst_49 = arith.constant 1.000000e+00 : f32
    %105 = vector.broadcast %cst_49 : f32 to vector<128x64xf32>
    %106 = arith.divf %105, %104 : vector<128x64xf32>
    %cst_50 = arith.constant 1.06140542 : f32
    %107 = vector.broadcast %cst_50 : f32 to vector<128x64xf32>
    %108 = arith.mulf %107, %106 : vector<128x64xf32>
    %cst_51 = arith.constant -1.45315206 : f32
    %109 = vector.broadcast %cst_51 : f32 to vector<128x64xf32>
    %110 = arith.addf %108, %109 : vector<128x64xf32>
    %111 = arith.mulf %110, %106 : vector<128x64xf32>
    %cst_52 = arith.constant 1.42141378 : f32
    %112 = vector.broadcast %cst_52 : f32 to vector<128x64xf32>
    %113 = arith.addf %111, %112 : vector<128x64xf32>
    %114 = arith.mulf %113, %106 : vector<128x64xf32>
    %cst_53 = arith.constant -0.284496725 : f32
    %115 = vector.broadcast %cst_53 : f32 to vector<128x64xf32>
    %116 = arith.addf %114, %115 : vector<128x64xf32>
    %117 = arith.mulf %116, %106 : vector<128x64xf32>
    %cst_54 = arith.constant 0.254829586 : f32
    %118 = vector.broadcast %cst_54 : f32 to vector<128x64xf32>
    %119 = arith.addf %117, %118 : vector<128x64xf32>
    %120 = arith.mulf %119, %106 : vector<128x64xf32>
    %cst_55 = arith.constant 0.000000e+00 : f32
    %121 = vector.broadcast %cst_55 : f32 to vector<128x64xf32>
    %122 = arith.subf %121, %100 : vector<128x64xf32>
    %123 = arith.mulf %122, %100 : vector<128x64xf32>
    %124 = math.exp %123 : vector<128x64xf32>
    %125 = arith.mulf %120, %124 : vector<128x64xf32>
    %cst_56 = arith.constant 1.000000e+00 : f32
    %126 = vector.broadcast %cst_56 : f32 to vector<128x64xf32>
    %127 = arith.subf %126, %125 : vector<128x64xf32>
    %cst_57 = arith.constant 0.000000e+00 : f32
    %128 = vector.broadcast %cst_57 : f32 to vector<128x64xf32>
    %129 = arith.cmpf olt, %99, %128 : vector<128x64xf32>
    %cst_58 = arith.constant 0.000000e+00 : f32
    %130 = vector.broadcast %cst_58 : f32 to vector<128x64xf32>
    %131 = arith.subf %130, %127 : vector<128x64xf32>
    %132 = arith.select %129, %131, %127 : vector<128x64xi1>, vector<128x64xf32>
    %cst_59 = arith.constant 1.000000e+00 : f32
    %133 = vector.broadcast %cst_59 : f32 to vector<128x64xf32>
    %134 = arith.addf %133, %132 : vector<128x64xf32>
    %135 = arith.mulf %97, %134 : vector<128x64xf32>
    %c0_60 = arith.constant 0 : index
    %c0_61 = arith.constant 0 : index
    %136 = vector.load %arg8[%c0_60, %c0_61] : memref<128x64xf32, #tpu.memory_space<vmem>>, vector<128x64xf32>
    tpu.vector_store %arg8[%c0_60, %c0_61], %135 {strides = array<i32>} : memref<128x64xf32, #tpu.memory_space<vmem>>, vector<128x64xf32>,
    return
  }
  func.func @transform_0(%arg0: i32) -> (i32, i32) {
    %c0_i32 = arith.constant 0 : i32
    %c0_i32_0 = arith.constant 0 : i32
    return %arg0, %c0_i32 : i32, i32
  }
  func.func @transform_1(%arg0: i32) -> (i32, i32) {
    %c0_i32 = arith.constant 0 : i32
    %c0_i32_0 = arith.constant 0 : i32
    %c0_i32_1 = arith.constant 0 : i32
    return %c0_i32, %c0_i32_0 : i32, i32
  }
  func.func @transform_2(%arg0: i32) -> (i32, i32) {
    %c0_i32 = arith.constant 0 : i32
    %c0_i32_0 = arith.constant 0 : i32
    %c0_i32_1 = arith.constant 0 : i32
    return %c0_i32, %c0_i32_0 : i32, i32
  }
  func.func @transform_3(%arg0: i32) -> (i32, i32) {
    %c0_i32 = arith.constant 0 : i32
    %c0_i32_0 = arith.constant 0 : i32
    %c0_i32_1 = arith.constant 0 : i32
    return %c0_i32, %c0_i32_0 : i32, i32
  }
  func.func @transform_4(%arg0: i32) -> (i32, i32) {
    %c0_i32 = arith.constant 0 : i32
    %c0_i32_0 = arith.constant 0 : i32
    %c0_i32_1 = arith.constant 0 : i32
    return %c0_i32, %c0_i32_0 : i32, i32
  }
  func.func @transform_5(%arg0: i32) -> (i32, i32) {
    %c0_i32 = arith.constant 0 : i32
    %c0_i32_0 = arith.constant 0 : i32
    %c0_i32_1 = arith.constant 0 : i32
    return %c0_i32, %c0_i32_0 : i32, i32
  }
  func.func @transform_6(%arg0: i32) -> (i32, i32) {
    %c0_i32 = arith.constant 0 : i32
    %c0_i32_0 = arith.constant 0 : i32
    %c0_i32_1 = arith.constant 0 : i32
    return %c0_i32, %c0_i32_0 : i32, i32
  }
  func.func @transform_7(%arg0: i32) -> (i32, i32) {
    %c0_i32 = arith.constant 0 : i32
    %c0_i32_0 = arith.constant 0 : i32
    return %arg0, %c0_i32 : i32, i32
  }
}

</mosaic_0001>

<bundles_post_ra>
// kernel: edgeconv2_forward.1
= control target key start
LH: loop header
LB: loop body
LE: loop exit
PB: predicated region body
PF: predicated region fallthrough
CT: control target
= control target key end

     0   :  { %12 = vsyncpa [#allocation3], 0  ;;  %s2500_s24 = smov [#allocation2]   ;;  %s3590_s0 = inlined_call_operand.vmem [shape: f32[128,128], index: 0, kind: input, shape index: {}]   ;;  %s3591_s1 = inlined_call_operand.vmem [shape: f32[128,64], index: 1, kind: input, shape index: {}]   ;;  %s3592_s2 = inlined_call_operand.vmem [shape: f32[1,64], index: 2, kind: input, shape index: {}]   ;;  %s3593_s3 = inlined_call_operand.vmem [shape: f32[64,64], index: 3, kind: input, shape index: {}]   ;;  %s3594_s4 = inlined_call_operand.vmem [shape: f32[1,64], index: 4, kind: input, shape index: {}]   ;;  %s3595_s5 = inlined_call_operand.hbm [shape: f32[64,64], index: 5, kind: input, shape index: {}]   ;;  %s3596_s6 = inlined_call_operand.vmem [shape: f32[1,64], index: 6, kind: input, shape index: {}]   ;;  %s3597_s7 = inlined_call_operand.vmem [shape: f32[128,64], index: 7, kind: output, shape index: {}]  }
   0x1   :  { %s28_s25 = sshll.u32 %s2500_s24, 4  ;;  %s2476_s28 = scalar_lea.hbm %s3595_s5, 1024  ;;  %s29_s25 = int_to_ptr.vmem [resolvable:$true] %s28_s25 }
   0x2   :  { %p2477_p0 = scmp.ne.s32.totalorder %s3595_s5, %s2476_s28  ;;  %p2480_p1 = scmp.lt.u32.totalorder %s2476_s28, %s3595_s5 }
   0x4   :  { %p2482_p2 = pnand %p2480_p1, %p2477_p0 }
   0x6   :  { %2485 = shalt.err (!%p2482_p2)
}
   0x7   :  { %s2486_s10 = scalar_lea.vmem %s29_s25, 1024  ;;  %p2491_p4 = scmp.lt.s32.totalorder %s29_s25, %s29_s25 }
   0x8   :  { %p2487_p3 = scmp.ne.s32.totalorder %s29_s25, %s2486_s10  ;;  %p2492_p5 = scmp.lt.s32.totalorder %s2486_s10, %s2486_s10 }
   0xa   :  { %p2493_p6 = por %p2492_p5, %p2491_p4 }
   0xc   :  { %p2494_p7 = pnand %p2493_p6, %p2487_p3 }
   0xe   :  { %2497 = shalt.err (!%p2494_p7)
}
   0xf   :  { %s2501_s11 = smov 128   ;;  %s2502_s12 = smov 8  }
  0x10   :  { %34 = dma.hbm_to_vmem [thread:$0]  %s3595_s5, 1024, %s29_s25, [#allocation3], %s2501_s11, %s2501_s11, %s2502_s12  }
  0x11   :  { %2498 = dma.done.wait [#allocation3], 1024  }
  0x12   :  { %2499 = vsyncadd [#allocation3], 4294966272  ;;  %v56_v0 = vld [vmem:[%s3591_s1] sm:$0xff]  ;;  %v57_v1 = vld [vmem:[%s3591_s1 + $0x8] sm:$0xff]  ;;  %vm671_vm1 = vcmask 523264  }
  0x13   :  { %v58_v2 = vld [vmem:[%s3591_s1 + $0x10] sm:$0xff]  ;;  %v2209_v3 = vpack.c.bf16 %v57_v1, %v56_v0  ;;  %v59_v4 = vld [vmem:[%s3591_s1 + $0x18] sm:$0xff]  ;;  %v60_v6 = vld [vmem:[%s3591_s1 + $0x20] sm:$0xff] }
  0x14   :  { %v2213_v5 = vpack.c.bf16 %v59_v4, %v58_v2  ;;  %v61_v7 = vld [vmem:[%s3591_s1 + $0x28] sm:$0xff]  ;;  %v40_v9 = vld [vmem:[%s3590_s0] sm:$0xff]  ;;  %v62_v10 = vld [vmem:[%s3591_s1 + $0x30] sm:$0xff] }
  0x15   :  { %2210 = vmatprep.subr.bf16.mxu0 %v2209_v3  ;;  %v2217_v8 = vpack.c.bf16 %v61_v7, %v60_v6  ;;  %v63_v11 = vld [vmem:[%s3591_s1 + $0x38] sm:$0xff]  ;;  %2105 = vmatprep.mubr.f32.mxu0 %v40_v9  ;;  %v64_v13 = vld [vmem:[%s3591_s1 + $0x40] sm:$0xff]  ;;  %v65_v14 = vld [vmem:[%s3591_s1 + $0x48] sm:$0xff] }
  0x16   :  { %2212 = vmatpush3.bf16.msra.mxu0 %v2209_v3  ;;  %v2221_v12 = vpack.c.bf16 %v63_v11, %v62_v10  ;;  %v2225_v15 = vpack.c.bf16 %v65_v14, %v64_v13  ;;  %v66_v16 = vld [vmem:[%s3591_s1 + $0x50] sm:$0xff]  ;;  %v67_v17 = vld [vmem:[%s3591_s1 + $0x58] sm:$0xff]  ;;  %v68_v19 = vld [vmem:[%s3591_s1 + $0x60] sm:$0xff] }
  0x17   :  { %2214 = vmatprep.subr.bf16.mxu0 %v2213_v5  ;;  %v2229_v18 = vpack.c.bf16 %v67_v17, %v66_v16  ;;  %v69_v20 = vld [vmem:[%s3591_s1 + $0x68] sm:$0xff]  ;;  %v70_v22 = vld [vmem:[%s3591_s1 + $0x70] sm:$0xff]  ;;  %v71_v23 = vld [vmem:[%s3591_s1 + $0x78] sm:$0xff] }
  0x18   :  { %v2233_v21 = vpack.c.bf16 %v69_v20, %v68_v19  ;;  %v2237_v24 = vpack.c.bf16 %v71_v23, %v70_v22  ;;  %v41_v25 = vld [vmem:[%s3590_s0 + $0x8] sm:$0xff]  ;;  %v42_v26 = vld [vmem:[%s3590_s0 + $0x10] sm:$0xff]  ;;  %v43_v27 = vld [vmem:[%s3590_s0 + $0x18] sm:$0xff] }
  0x19   :  { %v44_v28 = vld [vmem:[%s3590_s0 + $0x20] sm:$0xff]  ;;  %v45_v29 = vld [vmem:[%s3590_s0 + $0x28] sm:$0xff]  ;;  %v46_v30 = vld [vmem:[%s3590_s0 + $0x30] sm:$0xff] }
  0x1a   :  { %2216 = vmatpush3.bf16.msra.mxu0 %v2213_v5  ;;  %v47_v31 = vld [vmem:[%s3590_s0 + $0x38] sm:$0xff]  ;;  %v48_v32 = vld [vmem:[%s3590_s0 + $0x40] sm:$0xff]  ;;  %v49_v33 = vld [vmem:[%s3590_s0 + $0x48] sm:$0xff] }
  0x1b   :  { %2218 = vmatprep.subr.bf16.mxu0 %v2217_v8  ;;  %v50_v34 = vld [vmem:[%s3590_s0 + $0x50] sm:$0xff]  ;;  %v51_v35 = vld [vmem:[%s3590_s0 + $0x58] sm:$0xff]  ;;  %v52_v36 = vld [vmem:[%s3590_s0 + $0x60] sm:$0xff] }
  0x1c   :  { %v53_v37 = vld [vmem:[%s3590_s0 + $0x68] sm:$0xff]  ;;  %v54_v38 = vld [vmem:[%s3590_s0 + $0x70] sm:$0xff]  ;;  %v55_v39 = vld [vmem:[%s3590_s0 + $0x78] sm:$0xff] }
  0x1d   :  { %v656_v40 = vld [vmem:[%s3593_s3] sm:$0xff]  ;;  %v657_v41 = vld [vmem:[%s3593_s3 + $0x8] sm:$0xff]  ;;  %v658_v43 = vld [vmem:[%s3593_s3 + $0x10] sm:$0xff] }
  0x1e   :  { %2220 = vmatpush3.bf16.msra.mxu0 %v2217_v8  ;;  %v2241_v42 = vpack.c.bf16 %v657_v41, %v656_v40  ;;  %v659_v44 = vld [vmem:[%s3593_s3 + $0x18] sm:$0xff]  ;;  %v660_v46 = vld [vmem:[%s3593_s3 + $0x20] sm:$0xff]  ;;  %v661_v47 = vld [vmem:[%s3593_s3 + $0x28] sm:$0xff] }
  0x1f   :  { %2222 = vmatprep.subr.bf16.mxu0 %v2221_v12  ;;  %v2245_v45 = vpack.c.bf16 %v659_v44, %v658_v43  ;;  %v2249_v48 = vpack.c.bf16 %v661_v47, %v660_v46  ;;  %v662_v49 = vld [vmem:[%s3593_s3 + $0x30] sm:$0xff]  ;;  %v663_v50 = vld [vmem:[%s3593_s3 + $0x38] sm:$0xff]  ;;  %v2678_v52 = vld [vmem:[%s3592_s2] ss:$0 sm:$0xff] }
  0x20   :  { %2273 = vmatprep.subr.bf16.mxu1 %v2241_v42  ;;  %v2253_v51 = vpack.c.bf16 %v663_v50, %v662_v49 }
  0x21   :  { %2277 = vmatpush3.bf16.msra.mxu1 %v2241_v42 }
  0x22   :  { %2224 = vmatpush3.bf16.msra.mxu0 %v2221_v12  ;;  %2274 = vmatprep.subr.bf16.mxu1 %v2245_v45 }
  0x23   :  { %2226 = vmatprep.subr.bf16.mxu0 %v2225_v15 }
  0x25   :  { %2278 = vmatpush3.bf16.msra.mxu1 %v2245_v45 }
  0x26   :  { %2228 = vmatpush3.bf16.msra.mxu0 %v2225_v15  ;;  %2275 = vmatprep.subr.bf16.mxu1 %v2249_v48 }
  0x27   :  { %2230 = vmatprep.subr.bf16.mxu0 %v2229_v18 }
  0x29   :  { %2279 = vmatpush3.bf16.msra.mxu1 %v2249_v48 }
  0x2a   :  { %2232 = vmatpush3.bf16.msra.mxu0 %v2229_v18  ;;  %2276 = vmatprep.subr.bf16.mxu1 %v2253_v51 }
  0x2b   :  { %2234 = vmatprep.subr.bf16.mxu0 %v2233_v21 }
  0x2d   :  { %2280 = vmatpush3.bf16.msra.mxu1 %v2253_v51 }
  0x2e   :  { %2236 = vmatpush3.bf16.msra.mxu0 %v2233_v21 }
  0x2f   :  { %2238 = vmatprep.subr.bf16.mxu0 %v2237_v24 }
  0x32   :  { %2240 = vmatpush3.bf16.msra.mxu0 %v2237_v24 }
  0x33   :  { %2242 = vmatprep.subr.bf16.mxu0 %v2241_v42 }
  0x35   :  { %2106 = vmatmul.mubr.f32.vlgmr.msra.gmra.mrb[0].mxu0 %v41_v25 }
  0x36   :  { %2108 = vmatprep.mubr.f32.mxu0 %v42_v26  ;;  %2244 = vmatpush3.bf16.msra.mxu0 %v2241_v42 }
  0x37   :  { %2246 = vmatprep.subr.bf16.mxu0 %v2245_v45 }
  0x39   :  { %2109 = vmatmul.mubr.f32.gmra.mrb[2].mxu0 %v43_v27 }
  0x3a   :  { %2111 = vmatprep.mubr.f32.mxu0 %v44_v28  ;;  %2248 = vmatpush3.bf16.msra.mxu0 %v2245_v45 }
  0x3b   :  { %2250 = vmatprep.subr.bf16.mxu0 %v2249_v48 }
  0x3d   :  { %2112 = vmatmul.mubr.f32.gmra.mrb[4].mxu0 %v45_v29 }
  0x3e   :  { %2114 = vmatprep.mubr.f32.mxu0 %v46_v30  ;;  %2252 = vmatpush3.bf16.msra.mxu0 %v2249_v48 }
  0x3f   :  { %2254 = vmatprep.subr.bf16.mxu0 %v2253_v51 }
  0x41   :  { %2115 = vmatmul.mubr.f32.gmra.mrb[6].mxu0 %v47_v31 }
  0x42   :  { %2117 = vmatprep.mubr.f32.mxu0 %v48_v32  ;;  %2256 = vmatpush3.bf16.msra.mxu0 %v2253_v51 }
  0x45   :  { %2118 = vmatmul.mubr.f32.gmra.mrb[8].mxu0 %v49_v33 }
  0x46   :  { %2120 = vmatprep.mubr.f32.mxu0 %v50_v34 }
  0x49   :  { %2121 = vmatmul.mubr.f32.gmra.mrb[10].mxu0 %v51_v35 }
  0x4a   :  { %2123 = vmatprep.mubr.f32.mxu0 %v52_v36 }
  0x4d   :  { %2124 = vmatmul.mubr.f32.gmra.mrb[12].mxu0 %v53_v37 }
  0x4e   :  { %2126 = vmatprep.mubr.f32.mxu0 %v54_v38 }
  0x51   :  { %2127 = vmatmul.mubr.f32.gmra.mrb[14].mxu0 %v55_v39 }
 0x108   :  { %v2107_v53 = vpop.f32.mrb[0].mxu0 }
 0x109   :  { %v2681_v54 = vadd.f32 %v2107_v53, %v2678_v52  ;;  %v145_v55 = vpop.f32.mrb[1].mxu0 }
 0x10a   :  { %v2684_v56 = vadd.f32 %v2678_v52, %v145_v55 }
 0x10b   :  { %v2687_v57 = vmul.f32 0.70710677, %v2681_v54 }
 0x10c   :  { %v2690_v58 = vmul.f32 0.70710677, %v2684_v56  ;;  %v2110_v59 = vpop.f32.mrb[2].mxu0 }
 0x10d   :  { %v257_v60 = vand.u32 2147483647, %v2687_v57  ;;  %v2694_v61 = vadd.f32 %v2110_v59, %v2678_v52  ;;  %v155_v62 = vpop.f32.mrb[3].mxu0  ;;  %vm577_vm0 = vcmp.lt.f32.partialorder %v2687_v57, 0.0 }
 0x10e   :  { %v256_v63 = vand.u32 2147483647, %v2690_v58  ;;  %v2698_v0 = vadd.f32 %v2678_v52, %v155_v62  ;;  %vm576_vm2 = vcmp.lt.f32.partialorder %v2690_v58, 0.0 }
 0x10f   :  { %v273_v1 = vmul.f32 0.3275911, %v257_v60  ;;  %v2701_v2 = vmul.f32 0.70710677, %v2694_v61  ;;  %v481_v14 = vsub.f32 0.0, %v257_v60 }
 0x110   :  { %v272_v3 = vmul.f32 0.3275911, %v256_v63  ;;  %v2704_v4 = vmul.f32 0.70710677, %v2698_v0  ;;  %v2113_v7 = vpop.f32.mrb[4].mxu0  ;;  %v480_v20 = vsub.f32 0.0, %v256_v63 }
 0x111   :  { %v289_v5 = vadd.f32 1.0, %v273_v1  ;;  %v259_v6 = vand.u32 2147483647, %v2701_v2  ;;  %v2708_v10 = vpop.f32.mrb[5].mxu0  ;;  %v2711_v16 = vadd.f32 %v2113_v7, %v2678_v52  ;;  %v497_v22 = vmul.f32 %v481_v14, %v257_v60 }
 0x112   :  { %v288_v8 = vadd.f32 1.0, %v272_v3  ;;  %v258_v9 = vand.u32 2147483647, %v2704_v4  ;;  %v496_v29 = vmul.f32 %v480_v20, %v256_v63  ;;  %vm579_vm3 = vcmp.lt.f32.partialorder %v2701_v2, 0.0 }
 0x113   :  { %2284 = vrcp.f32 %v289_v5  ;;  %v275_v11 = vmul.f32 0.3275911, %v259_v6  ;;  %v2714_v19 = vmul.f32 0.70710677, %v2711_v16  ;;  %v483_v30 = vsub.f32 0.0, %v259_v6 }
 0x114   :  { %2286 = vrcp.f32 %v288_v8  ;;  %v274_v12 = vmul.f32 0.3275911, %v258_v9  ;;  %v2116_v13 = vpop.f32.mrb[6].mxu0  ;;  %v514_v33 = vmul.f32 1.442695, %v497_v22  ;;  %v482_v39 = vsub.f32 0.0, %v258_v9 }
 0x115   :  { %v291_v15 = vadd.f32 1.0, %v275_v11  ;;  %v175_v17 = vpop.f32.mrb[7].mxu0  ;;  %v2717_v23 = vand.u32 2147483647, %v2714_v19  ;;  %v2720_v24 = vadd.f32 %v2116_v13, %v2678_v52  ;;  %v512_v45 = vmul.f32 1.442695, %v496_v29 }
 0x116   :  { %v290_v18 = vadd.f32 1.0, %v274_v12  ;;  %v2725_v26 = vadd.f32 %v2678_v52, %v175_v17  ;;  %v499_v46 = vmul.f32 %v483_v30, %v259_v6  ;;  %v498_v62 = vmul.f32 %v482_v39, %v258_v9 }
 0x117   :  { %2288 = vrcp.f32 %v291_v15  ;;  %v277_v27 = vmul.f32 0.3275911, %v2717_v23  ;;  %v2729_v28 = vmul.f32 0.70710677, %v2720_v24  ;;  %vm578_vm4 = vcmp.lt.f32.partialorder %v2704_v4, 0.0 }
 0x118   :  { %2290 = vrcp.f32 %v290_v18  ;;  %v2119_v21 = vpop.f32.mrb[8].mxu0  ;;  %v2732_v31 = vmul.f32 0.70710677, %v2725_v26  ;;  %v518_v7 = vmul.f32 1.442695, %v499_v46  ;;  %v227_v2 = vmul.f32 0.5, %v2694_v61 }
 0x119   :  { %v2722_v25 = vpop.f32.mrb[9].mxu0  ;;  %v293_v34 = vadd.f32 1.0, %v277_v27  ;;  %v2737_v35 = vand.u32 2147483647, %v2729_v28  ;;  %v2765_v8 = vadd.f32 %v2119_v21, %v2678_v52  ;;  %v516_v15 = vmul.f32 1.442695, %v498_v62 }
 0x11a   :  { %v2745_v40 = vand.u32 2147483647, %v2732_v31  ;;  %vm581_vm5 = vcmp.lt.f32.partialorder %v2714_v19, 0.0  ;;  %vm582_vm6 = vcmp.lt.f32.partialorder %v2732_v31, 0.0  ;;  %vm583_vm7 = vcmp.lt.f32.partialorder %v2729_v28, 0.0 }
 0x11b   :  { %2292 = vrcp.f32 %v293_v34  ;;  %v279_v43 = vmul.f32 0.3275911, %v2737_v35  ;;  %v2776_v27 = vmul.f32 0.70710677, %v2765_v8 }
 0x11c   :  { %v2739_v36 = vpop.f32.mrb[10].mxu0  ;;  %v278_v51 = vmul.f32 0.3275911, %v2745_v40  ;;  %2294 = vpow2.f32 %v514_v33 }
 0x11d   :  { %v2734_v32 = vpop.eup %2284  ;;  %v2747_v41 = vpop.f32.mrb[11].mxu0  ;;  %v295_v50 = vadd.f32 1.0, %v279_v43  ;;  %vm585_vm10 = vcmp.lt.f32.partialorder %v2776_v27, 0.0 }
 0x11e   :  { %v2741_v37 = vpop.eup %2286  ;;  %v337_v38 = vmul.f32 1.0614054, %v2734_v32  ;;  %v294_v3 = vadd.f32 1.0, %v278_v51 }
 0x11f   :  { %v336_v42 = vmul.f32 1.0614054, %v2741_v37  ;;  %2296 = vrcp.f32 %v295_v50 }
 0x120   :  { %v353_v44 = vadd.f32 -1.4531521, %v337_v38  ;;  %v2751_v47 = vpop.f32.mrb[12].mxu0  ;;  %2298 = vrcp.f32 %v294_v3 }
 0x121   :  { %v2753_v48 = vpop.eup %2288  ;;  %v352_v49 = vadd.f32 -1.4531521, %v336_v42  ;;  %v2756_v53 = vpop.f32.mrb[13].mxu0  ;;  %2300 = vpow2.f32 %v512_v45 }
 0x122   :  { %v2758_v55 = vpop.eup %2290  ;;  %v369_v59 = vmul.f32 %v2734_v32, %v353_v44  ;;  %v339_v60 = vmul.f32 1.0614054, %v2753_v48  ;;  %2302 = vpow2.f32 %v518_v7  ;;  %v2786_v44 = vand.u32 2147483647, %v2776_v27 }
 0x123   :  { %v368_v63 = vmul.f32 %v2741_v37, %v352_v49  ;;  %v338_v1 = vmul.f32 1.0614054, %v2758_v55  ;;  %2304 = vpow2.f32 %v516_v15  ;;  %v485_v15 = vsub.f32 0.0, %v2717_v23 }
 0x124   :  { %v385_v5 = vadd.f32 1.4214138, %v369_v59  ;;  %v355_v6 = vadd.f32 -1.4531521, %v339_v60  ;;  %v2767_v13 = vpop.f32.mrb[14].mxu0  ;;  %v225_v59 = vmul.f32 0.5, %v2681_v54 }
 0x125   :  { %v384_v11 = vadd.f32 1.4214138, %v368_v63  ;;  %v354_v12 = vadd.f32 -1.4531521, %v338_v1  ;;  %v2771_v17 = vpop.f32.mrb[15].mxu0  ;;  %v2778_v29 = vpop.eup %2292  ;;  %v224_v60 = vmul.f32 0.5, %v2684_v56 }
 0x126   :  { %v401_v14 = vmul.f32 %v2734_v32, %v385_v5  ;;  %v371_v9 = vmul.f32 %v2753_v48, %v355_v6  ;;  %v341_v39 = vmul.f32 1.0614054, %v2778_v29  ;;  %v2295_v45 = vpop.eup %2294  ;;  %v281_v56 = vmul.f32 0.3275911, %v2786_v44 }
 0x127   :  { %v400_v18 = vmul.f32 %v2741_v37, %v384_v11  ;;  %v370_v20 = vmul.f32 %v2758_v55, %v354_v12 }
 0x128   :  { %v417_v22 = vadd.f32 -0.28449672, %v401_v14  ;;  %v387_v21 = vadd.f32 1.4214138, %v371_v9  ;;  %v357_v50 = vadd.f32 -1.4531521, %v341_v39 }
 0x129   :  { %v416_v30 = vadd.f32 -0.28449672, %v400_v18  ;;  %v386_v33 = vadd.f32 1.4214138, %v370_v20  ;;  %v2788_v51 = vpop.eup %2296 }
 0x12a   :  { %v433_v34 = vmul.f32 %v2734_v32, %v417_v22  ;;  %v403_v38 = vmul.f32 %v2753_v48, %v387_v21  ;;  %v373_v5 = vmul.f32 %v2778_v29, %v357_v50  ;;  %v343_v6 = vmul.f32 1.0614054, %v2788_v51  ;;  %v2796_v7 = vpop.eup %2298 }
 0x12b   :  { %v432_v42 = vmul.f32 %v2741_v37, %v416_v30  ;;  %v402_v43 = vmul.f32 %v2758_v55, %v386_v33  ;;  %v2301_v12 = vpop.eup %2300  ;;  %v342_v21 = vmul.f32 1.0614054, %v2796_v7  ;;  %v2811_v50 = vadd.f32 %v2678_v52, %v2708_v10 }
 0x12c   :  { %v449_v46 = vadd.f32 0.2548296, %v433_v34  ;;  %v419_v49 = vadd.f32 -0.28449672, %v403_v38  ;;  %v359_v22 = vadd.f32 -1.4531521, %v343_v6  ;;  %v2303_v33 = vpop.eup %2302 }
 0x12d   :  { %v448_v62 = vadd.f32 0.2548296, %v432_v42  ;;  %v418_v63 = vadd.f32 -0.28449672, %v402_v43  ;;  %v358_v39 = vadd.f32 -1.4531521, %v342_v21  ;;  %v2305_v43 = vpop.eup %2304 }
 0x12e   :  { %v465_v1 = vmul.f32 %v2734_v32, %v449_v46  ;;  %v435_v3 = vmul.f32 %v2753_v48, %v419_v49  ;;  %v389_v32 = vadd.f32 1.4214138, %v373_v5  ;;  %v297_v42 = vadd.f32 1.0, %v281_v56 }
 0x12f   :  { %v464_v11 = vmul.f32 %v2741_v37, %v448_v62  ;;  %v434_v54 = vmul.f32 %v2758_v55, %v418_v63  ;;  %v501_v49 = vmul.f32 %v485_v15, %v2717_v23  ;;  %v374_v5 = vmul.f32 %v2796_v7, %v358_v39 }
 0x130   :  { %v545_v14 = vmul.f32 %v2295_v45, %v465_v1  ;;  %v451_v9 = vadd.f32 0.2548296, %v435_v3  ;;  %v375_v1 = vmul.f32 %v2788_v51, %v359_v22  ;;  %2306 = vrcp.f32 %v297_v42 }
 0x131   :  { %v544_v18 = vmul.f32 %v2301_v12, %v464_v11  ;;  %v450_v20 = vadd.f32 0.2548296, %v434_v54  ;;  %v522_v56 = vmul.f32 1.442695, %v501_v49  ;;  %v2822_v12 = vmul.f32 0.70710677, %v2811_v50 }
 0x132   :  { %v561_v30 = vsub.f32 1.0, %v545_v14  ;;  %v467_v37 = vmul.f32 %v2753_v48, %v451_v9  ;;  %v405_v48 = vmul.f32 %v2778_v29, %v389_v32  ;;  %v391_v9 = vadd.f32 1.4214138, %v375_v1 }
 0x133   :  { %v560_v34 = vsub.f32 1.0, %v544_v18  ;;  %v466_v38 = vmul.f32 %v2758_v55, %v450_v20  ;;  %v2826_v32 = vadd.f32 %v2678_v52, %v2722_v25  ;;  %v487_v18 = vsub.f32 0.0, %v2737_v35 }
 0x134   :  { %v593_v45 = vsub.f32 0.0, %v561_v30  ;;  %v547_v46 = vmul.f32 %v2303_v33, %v467_v37  ;;  %v421_v57 = vadd.f32 -0.28449672, %v405_v48  ;;  %v390_v20 = vadd.f32 1.4214138, %v374_v5 }
 0x135   :  { %v592_v62 = vsub.f32 0.0, %v560_v34  ;;  %v546_v63 = vmul.f32 %v2305_v43, %v466_v38  ;;  %v486_v37 = vsub.f32 0.0, %v2745_v40  ;;  %v226_v33 = vmul.f32 0.5, %v2698_v0 }
 0x136   :  { %v609_v55 = vsel %vm577_vm0, %v593_v45, %v561_v30  ;;  %v563_v3 = vsub.f32 1.0, %v547_v46  ;;  %v2837_v25 = vadd.f32 %v2739_v36, %v2678_v52  ;;  %v2844_v4 = vmul.f32 0.70710677, %v2826_v32 }
 0x137   :  { %v625_v6 = vadd.f32 1.0, %v609_v55  ;;  %v608_v23 = vsel %vm576_vm2, %v592_v62, %v560_v34  ;;  %v562_v10 = vsub.f32 1.0, %v546_v63  ;;  %2308 = vpow2.f32 %v522_v56 }
 0x138   :  { %v624_v11 = vadd.f32 1.0, %v608_v23  ;;  %v595_v54 = vsub.f32 0.0, %v563_v3  ;;  %v503_v0 = vmul.f32 %v487_v18, %v2737_v35  ;;  %v406_v36 = vmul.f32 %v2796_v7, %v390_v20 }
 0x139   :  { %v594_v14 = vsub.f32 0.0, %v562_v10  ;;  %v641_v22 = vmul.f32 %v625_v6, %v225_v59  ;;  %v407_v59 = vmul.f32 %v2788_v51, %v391_v9  ;;  %v260_v42 = vand.u32 2147483647, %v2822_v12 }
 0x13a   :  { %v640_v15 = vmul.f32 %v624_v11, %v224_v60  ;;  %v611_v58 = vsel %vm579_vm3, %v595_v54, %v563_v3  ;;  %v437_v60 = vmul.f32 %v2778_v29, %v421_v57  ;;  %v502_v61 = vmul.f32 %v486_v37, %v2745_v40  ;;  %v2862_v35 = vpop.eup %2306 }
 0x13b   :  { %v627_v21 = vadd.f32 1.0, %v611_v58  ;;  %v610_v30 = vsel %vm578_vm4, %v594_v14, %v562_v10  ;;  %v2852_v43 = vand.u32 2147483647, %v2844_v4  ;;  %v2855_v45 = vmul.f32 0.70710677, %v2837_v25 }
 0x13c   :  { %v626_v34 = vadd.f32 1.0, %v610_v30  ;;  %2145 = vmatprep.mubr.msk.f32.mxu0 %vm671_vm1, %v640_v15  ;;  %v2859_v46 = vadd.f32 %v2678_v52, %v2747_v41  ;;  %v453_v49 = vadd.f32 0.2548296, %v437_v60  ;;  %v423_v62 = vadd.f32 -0.28449672, %v407_v59 }
 0x13d   :  { %2146 = vmatmul.mubr.msk.f32.vlgmr.msra.gmra.mrb[16].mxu0 %vm671_vm1, %v641_v22  ;;  %v643_v39 = vmul.f32 %v627_v21, %v227_v2  ;;  %v280_v63 = vmul.f32 0.3275911, %v2852_v43  ;;  %v526_v40 = vmul.f32 1.442695, %v503_v0  ;;  %v422_v48 = vadd.f32 -0.28449672, %v406_v36 }
 0x13e   :  { %v642_v38 = vmul.f32 %v626_v34, %v226_v33  ;;  %v2867_v1 = vand.u32 2147483647, %v2855_v45  ;;  %v276_v55 = vmul.f32 0.3275911, %v260_v42  ;;  %v484_v3 = vsub.f32 0.0, %v260_v42 }
 0x13f   :  { %v524_v5 = vmul.f32 1.442695, %v502_v61  ;;  %v296_v41 = vadd.f32 1.0, %v280_v63  ;;  %v345_v6 = vmul.f32 1.0614054, %v2862_v35  ;;  %v469_v11 = vmul.f32 %v2778_v29, %v453_v49 }
 0x140   :  { %2148 = vmatprep.mubr.msk.f32.mxu0 %vm671_vm1, %v642_v38  ;;  %v283_v23 = vmul.f32 0.3275911, %v2867_v1  ;;  %v2872_v10 = vmul.f32 0.70710677, %v2859_v46  ;;  %v439_v54 = vmul.f32 %v2788_v51, %v423_v62  ;;  %v438_v56 = vmul.f32 %v2796_v7, %v422_v48 }
 0x141   :  { %2149 = vmatmul.mubr.msk.f32.gmra.mrb[18].mxu0 %vm671_vm1, %v643_v39  ;;  %2310 = vrcp.f32 %v296_v41  ;;  %v292_v57 = vadd.f32 1.0, %v276_v55  ;;  %v489_v9 = vsub.f32 0.0, %v2786_v44  ;;  %v2880_v15 = vadd.f32 %v2751_v47, %v2678_v52  ;;  %v2309_v58 = vpop.eup %2308 }
 0x142   :  { %2312 = vpow2.f32 %v526_v40  ;;  %v299_v14 = vadd.f32 1.0, %v283_v23  ;;  %v500_v18 = vmul.f32 %v484_v3, %v260_v42  ;;  %v361_v20 = vadd.f32 -1.4531521, %v345_v6 }
 0x143   :  { %2314 = vpow2.f32 %v524_v5  ;;  %v266_v29 = vand.u32 2147483647, %v2872_v10  ;;  %v549_v22 = vmul.f32 %v2309_v58, %v469_v11  ;;  %v455_v21 = vadd.f32 0.2548296, %v439_v54 }
 0x144   :  { %2316 = vrcp.f32 %v299_v14  ;;  %v2884_v30 = vmul.f32 0.5, %v2711_v16  ;;  %v454_v37 = vadd.f32 0.2548296, %v438_v56  ;;  %v2887_v34 = vmul.f32 0.5, %v2811_v50 }
 0x145   :  { %v282_v33 = vmul.f32 0.3275911, %v266_v29  ;;  %v505_v2 = vmul.f32 %v489_v9, %v2786_v44  ;;  %v2891_v47 = vmul.f32 0.70710677, %v2880_v15  ;;  %v2895_v60 = vadd.f32 %v2678_v52, %v2756_v53 }
 0x146   :  { %2318 = vrcp.f32 %v292_v57  ;;  %v520_v59 = vmul.f32 1.442695, %v500_v18  ;;  %v377_v38 = vmul.f32 %v2862_v35, %v361_v20  ;;  %v565_v0 = vsub.f32 1.0, %v549_v22 }
 0x147   :  { %v298_v16 = vadd.f32 1.0, %v282_v33  ;;  %v471_v36 = vmul.f32 %v2788_v51, %v455_v21  ;;  %v2900_v50 = vand.u32 2147483647, %v2891_v47  ;;  %v2904_v44 = vadd.f32 %v2767_v13, %v2678_v52 }
 0x148   :  { %v470_v39 = vmul.f32 %v2796_v7, %v454_v37  ;;  %v488_v53 = vsub.f32 0.0, %v2852_v43  ;;  %v2909_v42 = vmul.f32 0.70710677, %v2895_v60  ;;  %v2915_v51 = vmul.f32 0.5, %v2725_v26 }
 0x149   :  { %2320 = vrcp.f32 %v298_v16  ;;  %v530_v49 = vmul.f32 1.442695, %v505_v2  ;;  %v285_v62 = vmul.f32 0.3275911, %v2900_v50  ;;  %v393_v63 = vadd.f32 1.4214138, %v377_v38 }
 0x14a   :  { %2322 = vpow2.f32 %v520_v59  ;;  %v268_v40 = vand.u32 2147483647, %v2909_v42  ;;  %v597_v55 = vsub.f32 0.0, %v565_v0  ;;  %v2923_v41 = vmul.f32 0.70710677, %v2904_v44 }
 0x14b   :  { %v2911_v61 = vpop.eup %2310  ;;  %v301_v5 = vadd.f32 1.0, %v285_v62  ;;  %v504_v11 = vmul.f32 %v488_v53, %v2852_v43  ;;  %v490_v14 = vsub.f32 0.0, %v266_v29  ;;  %v409_v9 = vmul.f32 %v2862_v35, %v393_v63 }
 0x14c   :  { %v2313_v13 = vpop.eup %2312  ;;  %v344_v7 = vmul.f32 1.0614054, %v2911_v61  ;;  %v284_v54 = vmul.f32 0.3275911, %v268_v40  ;;  %v2932_v57 = vand.u32 2147483647, %v2923_v41  ;;  %v2938_v20 = vadd.f32 %v2678_v52, %v2771_v17 }
 0x14d   :  { %v2315_v48 = vpop.eup %2314  ;;  %v2920_v3 = vmul.f32 %v2313_v13, %v471_v36  ;;  %2324 = vrcp.f32 %v301_v5  ;;  %v2942_v43 = vsel %vm581_vm5, %v597_v55, %v565_v0  ;;  %v491_v59 = vsub.f32 0.0, %v2867_v1 }
 0x14e   :  { %v2925_v26 = vpop.eup %2316  ;;  %v2927_v6 = vmul.f32 %v2315_v48, %v470_v39  ;;  %v360_v23 = vadd.f32 -1.4531521, %v344_v7  ;;  %v300_v18 = vadd.f32 1.0, %v284_v54  ;;  %2326 = vpow2.f32 %v530_v49 }
 0x14f   :  { %v347_v56 = vmul.f32 1.0614054, %v2925_v26  ;;  %v287_v21 = vmul.f32 0.3275911, %v2932_v57  ;;  %v567_v33 = vsub.f32 1.0, %v2920_v3  ;;  %v506_v17 = vmul.f32 %v490_v14, %v266_v29 }
 0x150   :  { %v376_v58 = vmul.f32 %v2911_v61, %v360_v23  ;;  %v2945_v37 = vpop.eup %2318  ;;  %2328 = vrcp.f32 %v300_v18  ;;  %v566_v38 = vsub.f32 1.0, %v2927_v6  ;;  %v425_v0 = vadd.f32 -0.28449672, %v409_v9 }
 0x151   :  { %v363_v22 = vadd.f32 -1.4531521, %v347_v56  ;;  %v303_v19 = vadd.f32 1.0, %v287_v21  ;;  %v528_v39 = vmul.f32 1.442695, %v504_v11  ;;  %v507_v29 = vmul.f32 %v491_v59, %v2867_v1 }
 0x152   :  { %v392_v2 = vadd.f32 1.4214138, %v376_v58  ;;  %v2955_v53 = vmul.f32 0.70710677, %v2938_v20  ;;  %v340_v13 = vmul.f32 1.0614054, %v2945_v37  ;;  %v441_v14 = vmul.f32 %v2862_v35, %v425_v0 }
 0x153   :  { %v379_v52 = vmul.f32 %v2925_v26, %v363_v22  ;;  %v2951_v16 = vpop.eup %2320  ;;  %2330 = vrcp.f32 %v303_v19  ;;  %v492_v48 = vsub.f32 0.0, %v268_v40  ;;  %v532_v11 = vmul.f32 1.442695, %v506_v17 }
 0x154   :  { %v408_v36 = vmul.f32 %v2911_v61, %v392_v2  ;;  %v346_v62 = vmul.f32 1.0614054, %v2951_v16  ;;  %v2959_v63 = vpop.eup %2322  ;;  %v2963_v55 = vand.u32 2147483647, %v2955_v53  ;;  %v356_v54 = vadd.f32 -1.4531521, %v340_v13 }
 0x155   :  { %v395_v49 = vadd.f32 1.4214138, %v379_v52  ;;  %v2968_v56 = vsub.f32 0.0, %v566_v38  ;;  %2332 = vpow2.f32 %v528_v39  ;;  %v493_v22 = vsub.f32 0.0, %v2900_v50 }
 0x156   :  { %v424_v7 = vadd.f32 -0.28449672, %v408_v36  ;;  %v362_v23 = vadd.f32 -1.4531521, %v346_v62  ;;  %v286_v58 = vmul.f32 0.3275911, %v2963_v55  ;;  %v372_v21 = vmul.f32 %v2945_v37, %v356_v54 }
 0x157   :  { %v411_v5 = vmul.f32 %v2925_v26, %v395_v49  ;;  %v2973_v1 = vpop.eup %2324  ;;  %v534_v2 = vmul.f32 1.442695, %v507_v29  ;;  %v508_v52 = vmul.f32 %v492_v48, %v268_v40  ;;  %2334 = vpow2.f32 %v532_v11 }
 0x158   :  { %v440_v9 = vmul.f32 %v2911_v61, %v424_v7  ;;  %v378_v18 = vmul.f32 %v2951_v16, %v362_v23  ;;  %v349_v59 = vmul.f32 1.0614054, %v2973_v1  ;;  %v302_v17 = vadd.f32 1.0, %v286_v58  ;;  %v2327_v19 = vpop.eup %2326 }
 0x159   :  { %v427_v0 = vadd.f32 -0.28449672, %v411_v5  ;;  %v388_v49 = vadd.f32 1.4214138, %v372_v21  ;;  %v457_v13 = vadd.f32 0.2548296, %v441_v14  ;;  %v509_v54 = vmul.f32 %v493_v22, %v2900_v50 }
 0x15a   :  { %v394_v36 = vadd.f32 1.4214138, %v378_v18  ;;  %v2979_v62 = vpop.eup %2328  ;;  %v456_v39 = vadd.f32 0.2548296, %v440_v9  ;;  %v365_v7 = vadd.f32 -1.4531521, %v349_v59  ;;  %2336 = vrcp.f32 %v302_v17 }
 0x15b   :  { %v348_v29 = vmul.f32 1.0614054, %v2979_v62  ;;  %v404_v40 = vmul.f32 %v2945_v37, %v388_v49  ;;  %2338 = vpow2.f32 %v534_v2  ;;  %v536_v5 = vmul.f32 1.442695, %v508_v52 }
 0x15c   :  { %v410_v23 = vmul.f32 %v2951_v16, %v394_v36  ;;  %v381_v48 = vmul.f32 %v2973_v1, %v365_v7  ;;  %v495_v11 = vsub.f32 0.0, %v2932_v57  ;;  %v443_v14 = vmul.f32 %v2925_v26, %v427_v0 }
 0x15d   :  { %v2987_v58 = vpop.eup %2330  ;;  %v364_v18 = vadd.f32 -1.4531521, %v348_v29  ;;  %v420_v21 = vadd.f32 -0.28449672, %v404_v40  ;;  %v473_v50 = vmul.f32 %v2862_v35, %v457_v13  ;;  %v472_v22 = vmul.f32 %v2911_v61, %v456_v39 }
 0x15e   :  { %v426_v9 = vadd.f32 -0.28449672, %v410_v23  ;;  %v397_v59 = vadd.f32 1.4214138, %v381_v48  ;;  %v351_v2 = vmul.f32 1.0614054, %v2987_v58  ;;  %v511_v23 = vmul.f32 %v495_v11, %v2932_v57 }
 0x15f   :  { %v538_v17 = vmul.f32 1.442695, %v509_v54  ;;  %v380_v36 = vmul.f32 %v2979_v62, %v364_v18  ;;  %v436_v49 = vmul.f32 %v2945_v37, %v420_v21  ;;  %v494_v29 = vsub.f32 0.0, %v2963_v55  ;;  %v2333_v35 = vpop.eup %2332 }
 0x160   :  { %v442_v52 = vmul.f32 %v2951_v16, %v426_v9  ;;  %v413_v0 = vmul.f32 %v2973_v1, %v397_v59  ;;  %v367_v7 = vadd.f32 -1.4531521, %v351_v2  ;;  %v459_v13 = vadd.f32 0.2548296, %v443_v14 }
 0x161   :  { %v396_v39 = vadd.f32 1.4214138, %v380_v36  ;;  %2340 = vpow2.f32 %v536_v5  ;;  %v552_v40 = vmul.f32 %v2333_v35, %v472_v22  ;;  %v452_v9 = vadd.f32 0.2548296, %v436_v49  ;;  %v2335_v18 = vpop.eup %2334 }
 0x162   :  { %v458_v61 = vadd.f32 0.2548296, %v442_v52  ;;  %v429_v48 = vadd.f32 -0.28449672, %v413_v0  ;;  %v383_v54 = vmul.f32 %v2987_v58, %v367_v7  ;;  %v3002_v21 = vmul.f32 %v2327_v19, %v473_v50 }
 0x163   :  { %2342 = vpow2.f32 %v538_v17  ;;  %v412_v57 = vmul.f32 %v2979_v62, %v396_v39  ;;  %vm580_vm8 = vcmp.lt.f32.partialorder %v2822_v12, 0.0  ;;  %v542_v22 = vmul.f32 1.442695, %v511_v23 }
 0x164   :  { %v474_v59 = vmul.f32 %v2951_v16, %v458_v61  ;;  %v3006_v11 = vpop.eup %2336  ;;  %v445_v5 = vmul.f32 %v2973_v1, %v429_v48  ;;  %v399_v14 = vadd.f32 1.4214138, %v383_v54  ;;  %v468_v2 = vmul.f32 %v2945_v37, %v452_v9 }
 0x165   :  { %v599_v52 = vsub.f32 0.0, %v567_v33  ;;  %vm584_vm9 = vcmp.lt.f32.partialorder %v2844_v4, 0.0  ;;  %v475_v16 = vmul.f32 %v2925_v26, %v459_v13  ;;  %v428_v19 = vadd.f32 -0.28449672, %v412_v57  ;;  %v2339_v17 = vpop.eup %2338 }
 0x166   :  { %v510_v50 = vmul.f32 %v494_v29, %v2963_v55  ;;  %v568_v36 = vsub.f32 1.0, %v552_v40  ;;  %v554_v49 = vmul.f32 %v2335_v18, %v474_v59  ;;  %v415_v0 = vmul.f32 %v2987_v58, %v399_v14 }
 0x167   :  { %v350_v7 = vmul.f32 1.0614054, %v3006_v11  ;;  %v614_v37 = vsel %vm582_vm6, %v2968_v56, %v566_v38  ;;  %v461_v23 = vadd.f32 0.2548296, %v445_v5  ;;  %v444_v35 = vmul.f32 %v2979_v62, %v428_v19 }
 0x168   :  { %v548_v26 = vmul.f32 %v2959_v63, %v468_v2  ;;  %v569_v55 = vsub.f32 1.0, %v3002_v21  ;;  %v431_v29 = vadd.f32 -0.28449672, %v415_v0  ;;  %2344 = vpow2.f32 %v542_v22 }
 0x169   :  { %v366_v13 = vadd.f32 -1.4531521, %v350_v7  ;;  %v3026_v61 = vmul.f32 %v2339_v17, %v475_v16  ;;  %v460_v39 = vadd.f32 0.2548296, %v444_v35  ;;  %v540_v40 = vmul.f32 1.442695, %v510_v50 }
 0x16a   :  { %v564_v48 = vsub.f32 1.0, %v548_v26  ;;  %v600_v6 = vsub.f32 0.0, %v568_v36  ;;  %v570_v54 = vsub.f32 1.0, %v554_v49  ;;  %v447_v31 = vmul.f32 %v2987_v58, %v431_v29 }
 0x16b   :  { %v382_v38 = vmul.f32 %v3006_v11, %v366_v13  ;;  %v2341_v56 = vpop.eup %2340  ;;  %v629_v9 = vadd.f32 1.0, %v2942_v43  ;;  %v477_v63 = vmul.f32 %v2973_v1, %v461_v23  ;;  %v476_v18 = vmul.f32 %v2979_v62, %v460_v39 }
 0x16c   :  { %v596_v21 = vsub.f32 0.0, %v564_v48  ;;  %v615_v59 = vsel %vm583_vm7, %v599_v52, %v567_v33  ;;  %v630_v57 = vadd.f32 1.0, %v614_v37  ;;  %v463_v5 = vadd.f32 0.2548296, %v447_v31 }
 0x16d   :  { %v398_v14 = vadd.f32 1.4214138, %v382_v38  ;;  %v2343_v22 = vpop.eup %2342  ;;  %v601_v2 = vsub.f32 0.0, %v569_v55  ;;  %v556_v16 = vmul.f32 %v2341_v56, %v476_v18  ;;  %2346 = vpow2.f32 %v540_v40 }
 0x16e   :  { %v612_v43 = vsel %vm580_vm8, %v596_v21, %v564_v48  ;;  %v616_v1 = vsel %vm584_vm9, %v600_v6, %v568_v36  ;;  %v571_v62 = vsub.f32 1.0, %v3026_v61  ;;  %v602_v19 = vsub.f32 0.0, %v570_v54 }
 0x16f   :  { %v414_v3 = vmul.f32 %v3006_v11, %v398_v14  ;;  %v557_v28 = vmul.f32 %v2343_v22, %v477_v63  ;;  %v572_v33 = vsub.f32 1.0, %v556_v16  ;;  %v479_v52 = vmul.f32 %v2987_v58, %v463_v5 }
 0x170   :  { %v628_v50 = vadd.f32 1.0, %v612_v43  ;;  %v645_v17 = vmul.f32 %v629_v9, %v2884_v30  ;;  %v232_v12 = vmul.f32 0.5, %v2826_v32  ;;  %v646_v4 = vmul.f32 %v630_v57, %v2915_v51 }
 0x171   :  { %v430_v49 = vadd.f32 -0.28449672, %v414_v3  ;;  %v632_v36 = vadd.f32 1.0, %v616_v1  ;;  %vm586_vm11 = vcmp.lt.f32.partialorder %v2872_v10, 0.0  ;;  %v631_v37 = vadd.f32 1.0, %v615_v59  ;;  %v1298_v1 = vld [vmem:[#allocation2 + $0x8] sm:$0xff] }
 0x172   :  { %v644_v0 = vmul.f32 %v628_v50, %v2887_v34  ;;  %v2345_v7 = vpop.eup %2344  ;;  %v618_v23 = vsel %vm586_vm11, %v602_v19, %v570_v54  ;;  %v604_v35 = vsub.f32 0.0, %v572_v33  ;;  %v617_v26 = vsel %vm585_vm10, %v601_v2, %v569_v55 }
 0x173   :  { %v446_v58 = vmul.f32 %v3006_v11, %v430_v49  ;;  %v603_v30 = vsub.f32 0.0, %v571_v62  ;;  %v573_v29 = vsub.f32 1.0, %v557_v28  ;;  %v559_v27 = vmul.f32 %v2345_v7, %v479_v52 }
 0x174   :  { %2151 = vmatprep.mubr.msk.f32.mxu1 %vm671_vm1, %v644_v0  ;;  %v231_v32 = vmul.f32 0.5, %v2720_v24  ;;  %v648_v10 = vmul.f32 %v632_v36, %v232_v12  ;;  %vm587_vm12 = vcmp.lt.f32.partialorder %v2855_v45, 0.0  ;;  %v634_v34 = vadd.f32 1.0, %v618_v23  ;;  %v1300_v12 = vld [vmem:[#allocation2 + $0x18] sm:$0xff] }
 0x175   :  { %v462_v51 = vadd.f32 0.2548296, %v446_v58  ;;  %2152 = vmatmul.mubr.msk.f32.vlgmr.msra.gmra.mrb[0].mxu1 %vm671_vm1, %v645_v17  ;;  %vm588_vm13 = vcmp.lt.f32.partialorder %v2909_v42, 0.0  ;;  %v633_v55 = vadd.f32 1.0, %v617_v26  ;;  %v619_v48 = vsel %vm587_vm12, %v603_v30, %v571_v62  ;;  %v1299_v17 = vld [vmem:[#allocation2 + $0x10] sm:$0xff] }
 0x176   :  { %2154 = vmatprep.mubr.msk.f32.mxu1 %vm671_vm1, %v646_v4  ;;  %v647_v13 = vmul.f32 %v631_v37, %v231_v32  ;;  %v620_v61 = vsel %vm588_vm13, %v604_v35, %v572_v33  ;;  %v234_v24 = vmul.f32 0.5, %v2859_v46  ;;  %v605_v6 = vsub.f32 0.0, %v573_v29 }
 0x177   :  { %v478_v39 = vmul.f32 %v3006_v11, %v462_v51  ;;  %v2347_v40 = vpop.eup %2346  ;;  %v575_v54 = vsub.f32 1.0, %v559_v27  ;;  %v233_v31 = vmul.f32 0.5, %v2765_v8  ;;  %v636_v42 = vadd.f32 1.0, %v620_v61  ;;  %v1301_v51 = vld [vmem:[#allocation2 + $0x20] sm:$0xff] }
 0x178   :  { %v650_v45 = vmul.f32 %v634_v34, %v234_v24  ;;  %v635_v9 = vadd.f32 1.0, %v619_v48  ;;  %vm589_vm14 = vcmp.lt.f32.partialorder %v2891_v47, 0.0  ;;  %v236_v18 = vmul.f32 0.5, %v2895_v60 }
 0x179   :  { %v558_v38 = vmul.f32 %v2347_v40, %v478_v39  ;;  %2155 = vmatmul.mubr.msk.f32.gmra.mrb[2].mxu1 %vm671_vm1, %v647_v13  ;;  %v649_v56 = vmul.f32 %v633_v55, %v233_v31  ;;  %v621_v63 = vsel %vm589_vm14, %v605_v6, %v573_v29  ;;  %v607_v46 = vsub.f32 0.0, %v575_v54  ;;  %v1303_v55 = vld [vmem:[#allocation2 + $0x30] sm:$0xff]  ;;  %v1304_v40 = vld [vmem:[#allocation2 + $0x38] sm:$0xff] }
 0x17a   :  { %2157 = vmatprep.mubr.msk.f32.mxu1 %vm671_vm1, %v648_v10  ;;  %v235_v21 = vmul.f32 0.5, %v2837_v25  ;;  %v652_v8 = vmul.f32 %v636_v42, %v236_v18  ;;  %vm590_vm15 = vcmp.lt.f32.partialorder %v2955_v53, 0.0  ;;  %v637_v5 = vadd.f32 1.0, %v621_v63  ;;  %v1302_v10 = vld [vmem:[#allocation2 + $0x28] sm:$0xff] }
 0x17b   :  { %v574_v11 = vsub.f32 1.0, %v558_v38  ;;  %vm591_vm0 = vcmp.lt.f32.partialorder %v2923_v41, 0.0  ;;  %v238_v22 = vmul.f32 0.5, %v2938_v20  ;;  %v237_v2 = vmul.f32 0.5, %v2880_v15  ;;  %v3080_v15 = vld [vmem:[%s3594_s4] ss:$0 sm:$0xff] }
 0x17c   :  { %v651_v57 = vmul.f32 %v635_v9, %v235_v21  ;;  %v623_v14 = vsel %vm591_vm0, %v607_v46, %v575_v54  ;;  %v239_v43 = vmul.f32 0.5, %v2904_v44  ;;  %v1297_v20 = vld [vmem:[#allocation2] sm:$0xff]  ;;  %v2261_v0 = vpack.c.bf16 %v1300_v12, %v1299_v17 }
 0x17d   :  { %v606_v59 = vsub.f32 0.0, %v574_v11  ;;  %2158 = vmatmul.mubr.msk.f32.gmra.mrb[4].mxu1 %vm671_vm1, %v649_v56  ;;  %v653_v16 = vmul.f32 %v637_v5, %v237_v2  ;;  %v639_v53 = vadd.f32 1.0, %v623_v14  ;;  %v2257_v62 = vpack.c.bf16 %v1298_v1, %v1297_v20 }
 0x17e   :  { %2160 = vmatprep.mubr.msk.f32.mxu1 %vm671_vm1, %v650_v45  ;;  %v2265_v39 = vpack.c.bf16 %v1302_v10, %v1301_v51  ;;  %v2269_v24 = vpack.c.bf16 %v1304_v40, %v1303_v55 }
 0x17f   :  { %v622_v47 = vsel %vm590_vm15, %v606_v59, %v574_v11  ;;  %v655_v41 = vmul.f32 %v639_v53, %v239_v43  ;;  %2258 = vmatprep.subr.bf16.mxu1 %v2257_v62 }
 0x180   :  { %v638_v60 = vadd.f32 1.0, %v622_v47  ;;  %2260 = vmatpush3.bf16.msra.mxu1 %v2257_v62 }
 0x181   :  { %2161 = vmatmul.mubr.msk.f32.gmra.mrb[6].mxu1 %vm671_vm1, %v651_v57  ;;  %2262 = vmatprep.subr.bf16.mxu1 %v2261_v0 }
 0x182   :  { %v654_v25 = vmul.f32 %v638_v60, %v238_v22  ;;  %2163 = vmatprep.mubr.msk.f32.mxu1 %vm671_vm1, %v652_v8 }
 0x184   :  { %2264 = vmatpush3.bf16.msra.mxu1 %v2261_v0 }
 0x185   :  { %2164 = vmatmul.mubr.msk.f32.gmra.mrb[8].mxu1 %vm671_vm1, %v653_v16  ;;  %2266 = vmatprep.subr.bf16.mxu1 %v2265_v39 }
 0x186   :  { %2166 = vmatprep.mubr.msk.f32.mxu1 %vm671_vm1, %v654_v25 }
 0x188   :  { %2268 = vmatpush3.bf16.msra.mxu1 %v2265_v39 }
 0x189   :  { %2167 = vmatmul.mubr.msk.f32.gmra.mrb[10].mxu1 %vm671_vm1, %v655_v41  ;;  %2270 = vmatprep.subr.bf16.mxu1 %v2269_v24 }
 0x18c   :  { %2272 = vmatpush3.bf16.msra.mxu1 %v2269_v24 }
 0x210   :  { %v2147_v19 = vpop.f32.mrb[16].mxu0 }
 0x211   :  { %v3083_v3 = vadd.f32 %v2147_v19, %v3080_v15  ;;  %v786_v44 = vpop.f32.mrb[17].mxu0 }
 0x212   :  { %v3086_v28 = vadd.f32 %v3080_v15, %v786_v44 }
 0x213   :  { %v3089_v33 = vmul.f32 0.70710677, %v3083_v3 }
 0x214   :  { %v3092_v52 = vmul.f32 0.70710677, %v3086_v28  ;;  %v2150_v50 = vpop.f32.mrb[18].mxu0 }
 0x215   :  { %v898_v49 = vand.u32 2147483647, %v3089_v33  ;;  %v3096_v4 = vadd.f32 %v2150_v50, %v3080_v15  ;;  %v796_v36 = vpop.f32.mrb[19].mxu0  ;;  %vm1218_vm2 = vcmp.lt.f32.partialorder %v3089_v33, 0.0 }
 0x216   :  { %v897_v7 = vand.u32 2147483647, %v3092_v52  ;;  %v3100_v37 = vadd.f32 %v3080_v15, %v796_v36  ;;  %vm1217_vm3 = vcmp.lt.f32.partialorder %v3092_v52, 0.0 }
 0x217   :  { %v914_v23 = vmul.f32 0.3275911, %v898_v49  ;;  %v3103_v35 = vmul.f32 0.70710677, %v3096_v4  ;;  %v1122_v6 = vsub.f32 0.0, %v898_v49 }
 0x218   :  { %v913_v58 = vmul.f32 0.3275911, %v897_v7  ;;  %v3106_v26 = vmul.f32 0.70710677, %v3100_v37  ;;  %v1121_v54 = vsub.f32 0.0, %v897_v7 }
 0x219   :  { %v930_v30 = vadd.f32 1.0, %v914_v23  ;;  %v900_v29 = vand.u32 2147483647, %v3103_v35  ;;  %v1138_v38 = vmul.f32 %v1122_v6, %v898_v49  ;;  %vm1220_vm4 = vcmp.lt.f32.partialorder %v3103_v35, 0.0 }
 0x21a   :  { %v929_v27 = vadd.f32 1.0, %v913_v58  ;;  %v899_v32 = vand.u32 2147483647, %v3106_v26  ;;  %v1137_v9 = vmul.f32 %v1121_v54, %v897_v7  ;;  %vm1219_vm5 = vcmp.lt.f32.partialorder %v3106_v26, 0.0 }
 0x21b   :  { %2348 = vrcp.f32 %v930_v30  ;;  %v916_v34 = vmul.f32 0.3275911, %v900_v29  ;;  %v1124_v45 = vsub.f32 0.0, %v900_v29  ;;  %v1155_v21 = vmul.f32 1.442695, %v1138_v38 }
 0x21c   :  { %2350 = vrcp.f32 %v929_v27  ;;  %v915_v13 = vmul.f32 0.3275911, %v899_v32  ;;  %v1123_v11 = vsub.f32 0.0, %v899_v32  ;;  %v1153_v47 = vmul.f32 1.442695, %v1137_v9 }
 0x21d   :  { %v932_v61 = vadd.f32 1.0, %v916_v34  ;;  %v1140_v8 = vmul.f32 %v1124_v45, %v900_v29 }
 0x21e   :  { %v931_v48 = vadd.f32 1.0, %v915_v13  ;;  %v1139_v22 = vmul.f32 %v1123_v11, %v899_v32 }
 0x21f   :  { %2352 = vrcp.f32 %v932_v61  ;;  %v1159_v43 = vmul.f32 1.442695, %v1140_v8 }
 0x220   :  { %2354 = vrcp.f32 %v931_v48  ;;  %v1157_v62 = vmul.f32 1.442695, %v1139_v22 }
 0x221   :  { %2356 = vpow2.f32 %v1155_v21 }
 0x222   :  { %2358 = vpow2.f32 %v1153_v47 }
 0x223   :  { %2360 = vpow2.f32 %v1159_v43 }
 0x224   :  { %2362 = vpow2.f32 %v1157_v62 }
 0x225   :  { %v2349_v31 = vpop.eup %2348 }
 0x226   :  { %v2351_v42 = vpop.eup %2350  ;;  %v978_v56 = vmul.f32 1.0614054, %v2349_v31 }
 0x227   :  { %v977_v63 = vmul.f32 1.0614054, %v2351_v42 }
 0x228   :  { %v994_v18 = vadd.f32 -1.4531521, %v978_v56 }
 0x229   :  { %v2353_v46 = vpop.eup %2352  ;;  %v993_v59 = vadd.f32 -1.4531521, %v977_v63 }
 0x22a   :  { %v2355_v57 = vpop.eup %2354  ;;  %v1010_v5 = vmul.f32 %v2349_v31, %v994_v18  ;;  %v980_v14 = vmul.f32 1.0614054, %v2353_v46 }
 0x22b   :  { %v1009_v60 = vmul.f32 %v2351_v42, %v993_v59  ;;  %v979_v2 = vmul.f32 1.0614054, %v2355_v57  ;;  %v2357_v10 = vpop.eup %2356 }
 0x22c   :  { %v1026_v25 = vadd.f32 1.4214138, %v1010_v5  ;;  %v996_v16 = vadd.f32 -1.4531521, %v980_v14  ;;  %v2359_v55 = vpop.eup %2358  ;;  %v865_v5 = vmul.f32 0.5, %v3086_v28  ;;  %v868_v28 = vmul.f32 0.5, %v3096_v4 }
 0x22d   :  { %v1025_v53 = vadd.f32 1.4214138, %v1009_v60  ;;  %v995_v41 = vadd.f32 -1.4531521, %v979_v2  ;;  %v2361_v54 = vpop.eup %2360 }
 0x22e   :  { %v1042_v20 = vmul.f32 %v2349_v31, %v1026_v25  ;;  %v1012_v1 = vmul.f32 %v2353_v46, %v996_v16  ;;  %v2363_v56 = vpop.eup %2362  ;;  %v867_v25 = vmul.f32 0.5, %v3100_v37 }
 0x22f   :  { %v1041_v19 = vmul.f32 %v2351_v42, %v1025_v53  ;;  %v1011_v44 = vmul.f32 %v2355_v57, %v995_v41 }
 0x230   :  { %v1058_v50 = vadd.f32 -0.28449672, %v1042_v20  ;;  %v1028_v17 = vadd.f32 1.4214138, %v1012_v1 }
 0x231   :  { %v1057_v12 = vadd.f32 -0.28449672, %v1041_v19  ;;  %v1027_v49 = vadd.f32 1.4214138, %v1011_v44 }
 0x232   :  { %v1074_v36 = vmul.f32 %v2349_v31, %v1058_v50  ;;  %v1044_v0 = vmul.f32 %v2353_v46, %v1028_v17 }
 0x233   :  { %v1073_v7 = vmul.f32 %v2351_v42, %v1057_v12  ;;  %v1043_v23 = vmul.f32 %v2355_v57, %v1027_v49 }
 0x234   :  { %v1090_v58 = vadd.f32 0.2548296, %v1074_v36  ;;  %v1060_v30 = vadd.f32 -0.28449672, %v1044_v0 }
 0x235   :  { %v1089_v29 = vadd.f32 0.2548296, %v1073_v7  ;;  %v1059_v27 = vadd.f32 -0.28449672, %v1043_v23 }
 0x236   :  { %v1106_v32 = vmul.f32 %v2349_v31, %v1090_v58  ;;  %v1076_v51 = vmul.f32 %v2353_v46, %v1060_v30 }
 0x237   :  { %v1105_v34 = vmul.f32 %v2351_v42, %v1089_v29  ;;  %v1075_v13 = vmul.f32 %v2355_v57, %v1059_v27 }
 0x238   :  { %v1186_v61 = vmul.f32 %v2357_v10, %v1106_v32  ;;  %v1092_v39 = vadd.f32 0.2548296, %v1076_v51 }
 0x239   :  { %v1185_v40 = vmul.f32 %v2359_v55, %v1105_v34  ;;  %v1091_v48 = vadd.f32 0.2548296, %v1075_v13 }
 0x23a   :  { %v1202_v24 = vsub.f32 1.0, %v1186_v61  ;;  %v1108_v6 = vmul.f32 %v2353_v46, %v1092_v39 }
 0x23b   :  { %v1201_v38 = vsub.f32 1.0, %v1185_v40  ;;  %v1107_v45 = vmul.f32 %v2355_v57, %v1091_v48  ;;  %v866_v57 = vmul.f32 0.5, %v3083_v3 }
 0x23c   :  { %v1234_v9 = vsub.f32 0.0, %v1202_v24  ;;  %v1188_v11 = vmul.f32 %v2361_v54, %v1108_v6 }
 0x23d   :  { %v1233_v31 = vsub.f32 0.0, %v1201_v38  ;;  %v1187_v63 = vmul.f32 %v2363_v56, %v1107_v45 }
 0x23e   :  { %v1250_v18 = vsel %vm1218_vm2, %v1234_v9, %v1202_v24  ;;  %v1204_v42 = vsub.f32 1.0, %v1188_v11 }
 0x23f   :  { %v1266_v21 = vadd.f32 1.0, %v1250_v18  ;;  %v1249_v59 = vsel %vm1217_vm3, %v1233_v31, %v1201_v38  ;;  %v1203_v8 = vsub.f32 1.0, %v1187_v63 }
 0x240   :  { %v1265_v46 = vadd.f32 1.0, %v1249_v59  ;;  %v1236_v47 = vsub.f32 0.0, %v1204_v42 }
 0x241   :  { %v1235_v14 = vsub.f32 0.0, %v1203_v8  ;;  %v1282_v60 = vmul.f32 %v1266_v21, %v866_v57 }
 0x242   :  { %v1281_v22 = vmul.f32 %v1265_v46, %v865_v5  ;;  %v1252_v33 = vsel %vm1220_vm4, %v1236_v47, %v1204_v42 }
 0x243   :  { %v1268_v2 = vadd.f32 1.0, %v1252_v33  ;;  %v1251_v52 = vsel %vm1219_vm5, %v1235_v14, %v1203_v8 }
 0x244   :  { %v1267_v16 = vadd.f32 1.0, %v1251_v52  ;;  %2185 = vmatprep.mubr.msk.f32.mxu1 %vm671_vm1, %v1281_v22 }
 0x245   :  { %2186 = vmatmul.mubr.msk.f32.vlgmr.msra.gmra.mrb[12].mxu1 %vm671_vm1, %v1282_v60  ;;  %v1284_v53 = vmul.f32 %v1268_v2, %v868_v28 }
 0x246   :  { %v1283_v3 = vmul.f32 %v1267_v16, %v867_v25 }
 0x248   :  { %2188 = vmatprep.mubr.msk.f32.mxu1 %vm671_vm1, %v1283_v3  ;;  %v2153_v35 = vpop.f32.mrb[0].mxu1 }
 0x249   :  { %2189 = vmatmul.mubr.msk.f32.gmra.mrb[14].mxu1 %vm671_vm1, %v1284_v53  ;;  %v812_v26 = vadd.f32 %v2153_v35, %v3080_v15  ;;  %v806_v43 = vpop.f32.mrb[1].mxu1 }
 0x24a   :  { %v807_v41 = vadd.f32 %v3080_v15, %v806_v43 }
 0x24b   :  { %v3124_v37 = vmul.f32 0.70710677, %v812_v26  ;;  %v3150_v45 = vmul.f32 0.5, %v812_v26 }
 0x24c   :  { %v3126_v20 = vmul.f32 0.70710677, %v807_v41  ;;  %v2156_v1 = vpop.f32.mrb[2].mxu1  ;;  %v3161_v21 = vmul.f32 0.5, %v807_v41 }
 0x24d   :  { %v902_v4 = vand.u32 2147483647, %v3124_v37  ;;  %v3130_v62 = vadd.f32 %v2156_v1, %v3080_v15  ;;  %v816_v19 = vpop.f32.mrb[3].mxu1  ;;  %vm1222_vm6 = vcmp.lt.f32.partialorder %v3124_v37, 0.0 }
 0x24e   :  { %v901_v44 = vand.u32 2147483647, %v3126_v20  ;;  %v817_v50 = vadd.f32 %v3080_v15, %v816_v19  ;;  %vm1221_vm7 = vcmp.lt.f32.partialorder %v3126_v20, 0.0 }
 0x24f   :  { %v918_v17 = vmul.f32 0.3275911, %v902_v4  ;;  %v3135_v12 = vmul.f32 0.70710677, %v3130_v62  ;;  %v1126_v7 = vsub.f32 0.0, %v902_v4 }
 0x250   :  { %v917_v49 = vmul.f32 0.3275911, %v901_v44  ;;  %v3137_v36 = vmul.f32 0.70710677, %v817_v50  ;;  %v2159_v58 = vpop.f32.mrb[4].mxu1  ;;  %v1125_v29 = vsub.f32 0.0, %v901_v44 }
 0x251   :  { %v934_v0 = vadd.f32 1.0, %v918_v17  ;;  %v904_v23 = vand.u32 2147483647, %v3135_v12  ;;  %v826_v32 = vpop.f32.mrb[5].mxu1  ;;  %v1142_v13 = vmul.f32 %v1126_v7, %v902_v4  ;;  %v3142_v39 = vadd.f32 %v2159_v58, %v3080_v15 }
 0x252   :  { %v933_v30 = vadd.f32 1.0, %v917_v49  ;;  %v903_v27 = vand.u32 2147483647, %v3137_v36  ;;  %v1141_v48 = vmul.f32 %v1125_v29, %v901_v44  ;;  %v3145_v6 = vadd.f32 %v3080_v15, %v826_v32 }
 0x253   :  { %2364 = vrcp.f32 %v934_v0  ;;  %v920_v51 = vmul.f32 0.3275911, %v904_v23  ;;  %v1128_v61 = vsub.f32 0.0, %v904_v23  ;;  %v3148_v38 = vmul.f32 0.70710677, %v3142_v39 }
 0x254   :  { %2366 = vrcp.f32 %v933_v30  ;;  %v919_v10 = vmul.f32 0.3275911, %v903_v27  ;;  %v2162_v34 = vpop.f32.mrb[6].mxu1  ;;  %v1127_v54 = vsub.f32 0.0, %v903_v27  ;;  %v3153_v56 = vmul.f32 0.70710677, %v3145_v6 }
 0x255   :  { %v936_v55 = vadd.f32 1.0, %v920_v51  ;;  %v836_v40 = vpop.f32.mrb[7].mxu1  ;;  %v1163_v11 = vmul.f32 1.442695, %v1142_v13  ;;  %v1144_v31 = vmul.f32 %v1128_v61, %v904_v23  ;;  %v906_v63 = vand.u32 2147483647, %v3148_v38 }
 0x256   :  { %v935_v24 = vadd.f32 1.0, %v919_v10  ;;  %v3157_v18 = vadd.f32 %v2162_v34, %v3080_v15  ;;  %v1161_v59 = vmul.f32 1.442695, %v1141_v48  ;;  %v905_v8 = vand.u32 2147483647, %v3153_v56 }
 0x257   :  { %2368 = vrcp.f32 %v936_v55  ;;  %v3165_v5 = vadd.f32 %v3080_v15, %v836_v40  ;;  %v1143_v46 = vmul.f32 %v1127_v54, %v903_v27  ;;  %v922_v47 = vmul.f32 0.3275911, %v906_v63 }
 0x258   :  { %2370 = vrcp.f32 %v935_v24  ;;  %v2165_v9 = vpop.f32.mrb[8].mxu1  ;;  %v1130_v57 = vsub.f32 0.0, %v906_v63  ;;  %v3168_v14 = vmul.f32 0.70710677, %v3157_v18  ;;  %v3170_v22 = vmul.f32 0.5, %v817_v50 }
 0x259   :  { %v3159_v42 = vpop.f32.mrb[9].mxu1  ;;  %v921_v33 = vmul.f32 0.3275911, %v905_v8  ;;  %v1129_v60 = vsub.f32 0.0, %v905_v8  ;;  %v3173_v2 = vmul.f32 0.70710677, %v3165_v5  ;;  %2372 = vpow2.f32 %v1163_v11 }
 0x25a   :  { %v1167_v25 = vmul.f32 1.442695, %v1144_v31  ;;  %v938_v16 = vadd.f32 1.0, %v922_v47  ;;  %v908_v28 = vand.u32 2147483647, %v3168_v14  ;;  %v1146_v26 = vmul.f32 %v1130_v57, %v906_v63 }
 0x25b   :  { %v937_v43 = vadd.f32 1.0, %v921_v33  ;;  %v907_v41 = vand.u32 2147483647, %v3173_v2  ;;  %v1165_v19 = vmul.f32 1.442695, %v1143_v46  ;;  %v1145_v17 = vmul.f32 %v1129_v60, %v905_v8 }
 0x25c   :  { %v3178_v3 = vpop.f32.mrb[10].mxu1  ;;  %2374 = vrcp.f32 %v938_v16  ;;  %v924_v44 = vmul.f32 0.3275911, %v908_v28  ;;  %v1132_v49 = vsub.f32 0.0, %v908_v28  ;;  %v1171_v32 = vmul.f32 1.442695, %v1146_v26 }
 0x25d   :  { %v3175_v52 = vpop.eup %2364  ;;  %v3184_v1 = vpop.f32.mrb[11].mxu1  ;;  %2376 = vrcp.f32 %v937_v43  ;;  %v923_v58 = vmul.f32 0.3275911, %v907_v41  ;;  %v1169_v40 = vmul.f32 1.442695, %v1145_v17  ;;  %v3196_v48 = vadd.f32 %v2165_v9, %v3080_v15 }
 0x25e   :  { %v3180_v53 = vpop.eup %2366  ;;  %v982_v35 = vmul.f32 1.0614054, %v3175_v52  ;;  %2378 = vpow2.f32 %v1161_v59  ;;  %v940_v23 = vadd.f32 1.0, %v924_v44  ;;  %v1148_v51 = vmul.f32 %v1132_v49, %v908_v28 }
 0x25f   :  { %v981_v4 = vmul.f32 1.0614054, %v3180_v53  ;;  %v939_v13 = vadd.f32 1.0, %v923_v58  ;;  %v1131_v11 = vsub.f32 0.0, %v907_v41  ;;  %v3203_v60 = vmul.f32 0.70710677, %v3196_v48 }
 0x260   :  { %v998_v50 = vadd.f32 -1.4531521, %v982_v35  ;;  %2380 = vrcp.f32 %v940_v23  ;;  %v1175_v59 = vmul.f32 1.442695, %v1148_v51  ;;  %vm1224_vm8 = vcmp.lt.f32.partialorder %v3135_v12, 0.0 }
 0x261   :  { %v3187_v0 = vpop.eup %2368  ;;  %v997_v7 = vadd.f32 -1.4531521, %v981_v4  ;;  %2382 = vrcp.f32 %v939_v13  ;;  %v1147_v57 = vmul.f32 %v1131_v11, %v907_v41  ;;  %v3216_v49 = vand.u32 2147483647, %v3203_v60 }
 0x262   :  { %v3189_v30 = vpop.eup %2370  ;;  %v1014_v29 = vmul.f32 %v3175_v52, %v998_v50  ;;  %v984_v27 = vmul.f32 1.0614054, %v3187_v0  ;;  %2384 = vpow2.f32 %v1167_v25  ;;  %vm1223_vm9 = vcmp.lt.f32.partialorder %v3137_v36, 0.0 }
 0x263   :  { %v1013_v10 = vmul.f32 %v3180_v53, %v997_v7  ;;  %v983_v34 = vmul.f32 1.0614054, %v3189_v30  ;;  %v2373_v8 = vpop.eup %2372  ;;  %2386 = vpow2.f32 %v1165_v19  ;;  %v1173_v25 = vmul.f32 1.442695, %v1147_v57 }
 0x264   :  { %v1030_v55 = vadd.f32 1.4214138, %v1014_v29  ;;  %v1000_v61 = vadd.f32 -1.4531521, %v984_v27  ;;  %2388 = vpow2.f32 %v1171_v32  ;;  %v3220_v29 = vadd.f32 %v3080_v15, %v3159_v42 }
 0x265   :  { %v1029_v24 = vadd.f32 1.4214138, %v1013_v10  ;;  %v999_v54 = vadd.f32 -1.4531521, %v983_v34  ;;  %2390 = vpow2.f32 %v1169_v40  ;;  %v926_v11 = vmul.f32 0.3275911, %v3216_v49 }
 0x266   :  { %v1046_v31 = vmul.f32 %v3175_v52, %v1030_v55  ;;  %v1016_v63 = vmul.f32 %v3187_v0, %v1000_v61  ;;  %v3205_v16 = vpop.eup %2374  ;;  %2392 = vpow2.f32 %v1175_v59  ;;  %v872_v12 = vmul.f32 0.5, %v3130_v62 }
 0x267   :  { %v1045_v46 = vmul.f32 %v3180_v53, %v1029_v24  ;;  %v1015_v47 = vmul.f32 %v3189_v30, %v999_v54  ;;  %v3207_v26 = vpop.eup %2376  ;;  %v986_v41 = vmul.f32 1.0614054, %v3205_v16  ;;  %2394 = vpow2.f32 %v1173_v25 }
 0x268   :  { %v1062_v33 = vadd.f32 -0.28449672, %v1046_v31  ;;  %v1032_v9 = vadd.f32 1.4214138, %v1016_v63  ;;  %v2379_v19 = vpop.eup %2378  ;;  %v985_v17 = vmul.f32 1.0614054, %v3207_v26 }
 0x269   :  { %v1061_v28 = vadd.f32 -0.28449672, %v1045_v46  ;;  %v1031_v35 = vadd.f32 1.4214138, %v1015_v47  ;;  %v1002_v58 = vadd.f32 -1.4531521, %v986_v41 }
 0x26a   :  { %v1078_v43 = vmul.f32 %v3175_v52, %v1062_v33  ;;  %v1048_v4 = vmul.f32 %v3187_v0, %v1032_v9  ;;  %v3222_v27 = vpop.eup %2380  ;;  %v1001_v10 = vadd.f32 -1.4531521, %v985_v17  ;;  %v3270_v62 = vmul.f32 0.70710677, %v3220_v29 }
 0x26b   :  { %v1077_v44 = vmul.f32 %v3180_v53, %v1061_v28  ;;  %v1047_v50 = vmul.f32 %v3189_v30, %v1031_v35  ;;  %v1018_v55 = vmul.f32 %v3205_v16, %v1002_v58  ;;  %v988_v61 = vmul.f32 1.0614054, %v3222_v27  ;;  %v3230_v42 = vpop.eup %2382 }
 0x26c   :  { %v1094_v7 = vadd.f32 0.2548296, %v1078_v43  ;;  %v1064_v23 = vadd.f32 -0.28449672, %v1048_v4  ;;  %v1017_v54 = vmul.f32 %v3207_v26, %v1001_v10  ;;  %v2385_v31 = vpop.eup %2384  ;;  %v987_v28 = vmul.f32 1.0614054, %v3230_v42 }
 0x26d   :  { %v1093_v32 = vadd.f32 0.2548296, %v1077_v44  ;;  %v1063_v51 = vadd.f32 -0.28449672, %v1047_v50  ;;  %v1034_v59 = vadd.f32 1.4214138, %v1018_v55  ;;  %v2387_v47 = vpop.eup %2386 }
 0x26e   :  { %v1110_v34 = vmul.f32 %v3175_v52, %v1094_v7  ;;  %v1080_v13 = vmul.f32 %v3187_v0, %v1064_v23  ;;  %v1004_v46 = vadd.f32 -1.4531521, %v988_v61  ;;  %v1033_v9 = vadd.f32 1.4214138, %v1017_v54 }
 0x26f   :  { %v1109_v40 = vmul.f32 %v3180_v53, %v1093_v32  ;;  %v1079_v24 = vmul.f32 %v3189_v30, %v1063_v51  ;;  %v2389_v53 = vpop.eup %2388  ;;  %v1050_v43 = vmul.f32 %v3205_v16, %v1034_v59  ;;  %v1003_v50 = vadd.f32 -1.4531521, %v987_v28 }
 0x270   :  { %v1190_v52 = vmul.f32 %v2373_v8, %v1110_v34  ;;  %v1096_v63 = vadd.f32 0.2548296, %v1080_v13  ;;  %v1020_v8 = vmul.f32 %v3222_v27, %v1004_v46  ;;  %v2391_v4 = vpop.eup %2390  ;;  %v1049_v44 = vmul.f32 %v3207_v26, %v1033_v9 }
 0x271   :  { %v1189_v57 = vmul.f32 %v2379_v19, %v1109_v40  ;;  %v1095_v33 = vadd.f32 0.2548296, %v1079_v24  ;;  %v2393_v17 = vpop.eup %2392  ;;  %v1066_v58 = vadd.f32 -0.28449672, %v1050_v43  ;;  %v1019_v34 = vmul.f32 %v3230_v42, %v1003_v50 }
 0x272   :  { %v1206_v35 = vsub.f32 1.0, %v1190_v52  ;;  %v1112_v25 = vmul.f32 %v3187_v0, %v1096_v63  ;;  %v1036_v32 = vadd.f32 1.4214138, %v1020_v8  ;;  %v1065_v10 = vadd.f32 -0.28449672, %v1049_v44  ;;  %v2395_v40 = vpop.eup %2394 }
 0x273   :  { %v1205_v41 = vsub.f32 1.0, %v1189_v57  ;;  %v1111_v19 = vmul.f32 %v3189_v30, %v1095_v33  ;;  %v1082_v61 = vmul.f32 %v3205_v16, %v1066_v58  ;;  %v1035_v9 = vadd.f32 1.4214138, %v1019_v34 }
 0x274   :  { %v1238_v7 = vsub.f32 0.0, %v1206_v35  ;;  %v1192_v23 = vmul.f32 %v2385_v31, %v1112_v25  ;;  %v1052_v30 = vmul.f32 %v3222_v27, %v1036_v32  ;;  %v1081_v52 = vmul.f32 %v3207_v26, %v1065_v10 }
 0x275   :  { %v1237_v51 = vsub.f32 0.0, %v1205_v41  ;;  %v1191_v0 = vmul.f32 %v2387_v47, %v1111_v19  ;;  %v1098_v46 = vadd.f32 0.2548296, %v1082_v61  ;;  %vm1226_vm10 = vcmp.lt.f32.partialorder %v3148_v38, 0.0 }
 0x276   :  { %v1254_v13 = vsel %vm1222_vm6, %v1238_v7, %v1206_v35  ;;  %v1208_v55 = vsub.f32 1.0, %v1192_v23  ;;  %v1068_v47 = vadd.f32 -0.28449672, %v1052_v30  ;;  %v1097_v33 = vadd.f32 0.2548296, %v1081_v52 }
 0x277   :  { %v1270_v24 = vadd.f32 1.0, %v1254_v13  ;;  %v1253_v54 = vsel %vm1221_vm7, %v1237_v51, %v1205_v41  ;;  %v1207_v31 = vsub.f32 1.0, %v1191_v0  ;;  %v1114_v20 = vmul.f32 %v3205_v16, %v1098_v46 }
 0x278   :  { %v1269_v63 = vadd.f32 1.0, %v1253_v54  ;;  %v1240_v59 = vsub.f32 0.0, %v1208_v55  ;;  %v1084_v25 = vmul.f32 %v3222_v27, %v1068_v47  ;;  %v1113_v41 = vmul.f32 %v3207_v26, %v1097_v33 }
 0x279   :  { %v1286_v37 = vmul.f32 %v1270_v24, %v3150_v45  ;;  %v1239_v57 = vsub.f32 0.0, %v1207_v31  ;;  %v1051_v45 = vmul.f32 %v3230_v42, %v1035_v9  ;;  %v1194_v44 = vmul.f32 %v2389_v53, %v1114_v20 }
 0x27a   :  { %v1285_v28 = vmul.f32 %v1269_v63, %v3161_v21  ;;  %v1256_v35 = vsel %vm1224_vm8, %v1240_v59, %v1208_v55  ;;  %v1100_v50 = vadd.f32 0.2548296, %v1084_v25  ;;  %v942_v7 = vadd.f32 1.0, %v926_v11 }
 0x27b   :  { %v1272_v43 = vadd.f32 1.0, %v1256_v35  ;;  %v1255_v8 = vsel %vm1223_vm9, %v1239_v57, %v1207_v31  ;;  %v1193_v21 = vmul.f32 %v2391_v4, %v1113_v41  ;;  %v1067_v16 = vadd.f32 -0.28449672, %v1051_v45 }
 0x27c   :  { %v1271_v19 = vadd.f32 1.0, %v1255_v8  ;;  %2191 = vmatprep.mubr.msk.f32.mxu1 %vm671_vm1, %v1285_v28  ;;  %v1210_v36 = vsub.f32 1.0, %v1194_v44  ;;  %v1116_v58 = vmul.f32 %v3222_v27, %v1100_v50  ;;  %2396 = vrcp.f32 %v942_v7 }
 0x27d   :  { %2192 = vmatmul.mubr.msk.f32.gmra.mrb[16].mxu1 %vm671_vm1, %v1286_v37  ;;  %v1288_v26 = vmul.f32 %v1272_v43, %v872_v12  ;;  %v1209_v32 = vsub.f32 1.0, %v1193_v21  ;;  %v1083_v53 = vmul.f32 %v3230_v42, %v1067_v16  ;;  %v873_v11 = vmul.f32 0.5, %v3145_v6 }
 0x27e   :  { %v1287_v23 = vmul.f32 %v1271_v19, %v3170_v22  ;;  %v1242_v51 = vsub.f32 0.0, %v1210_v36  ;;  %v1196_v0 = vmul.f32 %v2393_v17, %v1116_v58  ;;  %v3276_v27 = vadd.f32 %v3178_v3, %v3080_v15 }
 0x27f   :  { %v1241_v22 = vsub.f32 0.0, %v1209_v32  ;;  %v1099_v4 = vadd.f32 0.2548296, %v1083_v53  ;;  %vm1225_vm11 = vcmp.lt.f32.partialorder %v3153_v56, 0.0  ;;  %v909_v17 = vand.u32 2147483647, %v3270_v62 }
 0x280   :  { %2194 = vmatprep.mubr.msk.f32.mxu1 %vm671_vm1, %v1287_v23  ;;  %v1258_v10 = vsel %vm1226_vm10, %v1242_v51, %v1210_v36  ;;  %v1212_v6 = vsub.f32 1.0, %v1196_v0  ;;  %v3284_v38 = vadd.f32 %v3080_v15, %v3184_v1  ;;  %v1134_v3 = vsub.f32 0.0, %v3216_v49 }
 0x281   :  { %2195 = vmatmul.mubr.msk.f32.gmra.mrb[18].mxu1 %vm671_vm1, %v1288_v26  ;;  %v1274_v34 = vadd.f32 1.0, %v1258_v10  ;;  %v1257_v13 = vsel %vm1225_vm11, %v1241_v22, %v1209_v32  ;;  %v1115_v55 = vmul.f32 %v3230_v42, %v1099_v4  ;;  %v925_v24 = vmul.f32 0.3275911, %v909_v17 }
 0x282   :  { %v1273_v61 = vadd.f32 1.0, %v1257_v13  ;;  %v1244_v30 = vsub.f32 0.0, %v1212_v6  ;;  %v874_v54 = vmul.f32 0.5, %v3142_v39  ;;  %v3289_v56 = vmul.f32 0.70710677, %v3276_v27 }
 0x283   :  { %v1195_v31 = vmul.f32 %v2395_v40, %v1115_v55  ;;  %v941_v63 = vadd.f32 1.0, %v925_v24  ;;  %vm1228_vm12 = vcmp.lt.f32.partialorder %v3168_v14, 0.0  ;;  %v1150_v47 = vmul.f32 %v1134_v3, %v3216_v49 }
 0x284   :  { %v1289_v52 = vmul.f32 %v1273_v61, %v873_v11  ;;  %v1290_v59 = vmul.f32 %v1274_v34, %v874_v54  ;;  %v912_v15 = vand.u32 2147483647, %v3289_v56  ;;  %v1260_v46 = vsel %vm1228_vm12, %v1244_v30, %v1212_v6 }
 0x285   :  { %v1211_v42 = vsub.f32 1.0, %v1195_v31  ;;  %2398 = vrcp.f32 %v941_v63  ;;  %v3295_v37 = vmul.f32 0.70710677, %v3284_v38  ;;  %vm1227_vm13 = vcmp.lt.f32.partialorder %v3173_v2, 0.0 }
 0x286   :  { %v2397_v1 = vpop.eup %2396  ;;  %2197 = vmatprep.mubr.msk.f32.mxu1 %vm671_vm1, %v1289_v52  ;;  %v928_v57 = vmul.f32 0.3275911, %v912_v15  ;;  %v1276_v33 = vadd.f32 1.0, %v1260_v46  ;;  %v875_v49 = vmul.f32 0.5, %v3165_v5  ;;  %v1179_v25 = vmul.f32 1.442695, %v1150_v47 }
 0x287   :  { %v1243_v39 = vsub.f32 0.0, %v1211_v42  ;;  %v990_v40 = vmul.f32 1.0614054, %v2397_v1  ;;  %2198 = vmatmul.mubr.msk.f32.gmra.mrb[20].mxu1 %vm671_vm1, %v1290_v59  ;;  %v911_v14 = vand.u32 2147483647, %v3295_v37  ;;  %v876_v8 = vmul.f32 0.5, %v3157_v18 }
 0x288   :  { %v944_v35 = vadd.f32 1.0, %v928_v57  ;;  %v1133_v19 = vsub.f32 0.0, %v909_v17  ;;  %v1136_v23 = vsub.f32 0.0, %v912_v15  ;;  %vm1230_vm14 = vcmp.lt.f32.partialorder %v3203_v60, 0.0 }
 0x289   :  { %v1259_v9 = vsel %vm1227_vm13, %v1243_v39, %v1211_v42  ;;  %v1006_v28 = vadd.f32 -1.4531521, %v990_v40  ;;  %v927_v43 = vmul.f32 0.3275911, %v911_v14  ;;  %v1292_v50 = vmul.f32 %v1276_v33, %v876_v8 }
 0x28a   :  { %v1275_v20 = vadd.f32 1.0, %v1259_v9  ;;  %2400 = vrcp.f32 %v944_v35  ;;  %v1149_v12 = vmul.f32 %v1133_v19, %v909_v17  ;;  %v1152_v51 = vmul.f32 %v1136_v23, %v912_v15 }
 0x28b   :  { %v1022_v41 = vmul.f32 %v2397_v1, %v1006_v28  ;;  %v943_v44 = vadd.f32 1.0, %v927_v43  ;;  %2402 = vpow2.f32 %v1179_v25  ;;  %v1135_v11 = vsub.f32 0.0, %v911_v14 }
 0x28c   :  { %v1291_v45 = vmul.f32 %v1275_v20, %v875_v49  ;;  %v1177_v58 = vmul.f32 1.442695, %v1149_v12  ;;  %v1183_v17 = vmul.f32 1.442695, %v1152_v51  ;;  %vm1229_vm15 = vcmp.lt.f32.partialorder %v3270_v62, 0.0 }
 0x28d   :  { %v1038_v2 = vadd.f32 1.4214138, %v1022_v41  ;;  %2404 = vrcp.f32 %v943_v44  ;;  %v1151_v55 = vmul.f32 %v1135_v11, %v911_v14  ;;  %v878_v60 = vmul.f32 0.5, %v3196_v48 }
 0x28e   :  { %2200 = vmatprep.mubr.msk.f32.mxu1 %vm671_vm1, %v1291_v45  ;;  %2406 = vpow2.f32 %v1177_v58  ;;  %vm1232_vm0 = vcmp.lt.f32.partialorder %v3289_v56, 0.0  ;;  %vm1231_vm2 = vcmp.lt.f32.partialorder %v3295_v37, 0.0  ;;  %v880_v51 = vmul.f32 0.5, %v3276_v27  ;;  %v3320_v56 = vld [vmem:[%s3596_s6] ss:$0 sm:$0xff] }
 0x28f   :  { %v1054_v7 = vmul.f32 %v2397_v1, %v1038_v2  ;;  %2201 = vmatmul.mubr.msk.f32.gmra.mrb[22].mxu1 %vm671_vm1, %v1292_v50  ;;  %v2399_v5 = vpop.eup %2398  ;;  %2408 = vpow2.f32 %v1183_v17  ;;  %v1181_v63 = vmul.f32 1.442695, %v1151_v55  ;;  %v877_v2 = vmul.f32 0.5, %v3220_v29 }
 0x290   :  { %v989_v16 = vmul.f32 1.0614054, %v2399_v5 }
 0x291   :  { %v1070_v21 = vadd.f32 -0.28449672, %v1054_v7  ;;  %2410 = vpow2.f32 %v1181_v63 }
 0x292   :  { %v1005_v36 = vadd.f32 -1.4531521, %v989_v16 }
 0x293   :  { %v1086_v18 = vmul.f32 %v2397_v1, %v1070_v21 }
 0x294   :  { %v2401_v26 = vpop.eup %2400  ;;  %v1021_v53 = vmul.f32 %v2399_v5, %v1005_v36 }
 0x295   :  { %v1102_v32 = vadd.f32 0.2548296, %v1086_v18  ;;  %v992_v0 = vmul.f32 1.0614054, %v2401_v26  ;;  %v2403_v10 = vpop.eup %2402 }
 0x296   :  { %v1037_v4 = vadd.f32 1.4214138, %v1021_v53  ;;  %v879_v53 = vmul.f32 0.5, %v3284_v38 }
 0x297   :  { %v1118_v22 = vmul.f32 %v2397_v1, %v1102_v32  ;;  %v1008_v6 = vadd.f32 -1.4531521, %v992_v0  ;;  %v2405_v34 = vpop.eup %2404 }
 0x298   :  { %v1053_v13 = vmul.f32 %v2399_v5, %v1037_v4  ;;  %v991_v3 = vmul.f32 1.0614054, %v2405_v34  ;;  %v2407_v40 = vpop.eup %2406 }
 0x299   :  { %v1198_v61 = vmul.f32 %v2403_v10, %v1118_v22  ;;  %v1024_v30 = vmul.f32 %v2401_v26, %v1008_v6  ;;  %v2409_v8 = vpop.eup %2408 }
 0x29a   :  { %v1069_v24 = vadd.f32 -0.28449672, %v1053_v13  ;;  %v1007_v31 = vadd.f32 -1.4531521, %v991_v3 }
 0x29b   :  { %v1040_v54 = vadd.f32 1.4214138, %v1024_v30  ;;  %v1214_v59 = vsub.f32 1.0, %v1198_v61  ;;  %v2411_v21 = vpop.eup %2410 }
 0x29c   :  { %v1085_v52 = vmul.f32 %v2399_v5, %v1069_v24  ;;  %v1023_v15 = vmul.f32 %v2405_v34, %v1007_v31 }
 0x29d   :  { %v1056_v42 = vmul.f32 %v2401_v26, %v1040_v54  ;;  %v1246_v57 = vsub.f32 0.0, %v1214_v59 }
 0x29e   :  { %v1101_v1 = vadd.f32 0.2548296, %v1085_v52  ;;  %v1039_v47 = vadd.f32 1.4214138, %v1023_v15 }
 0x29f   :  { %v1072_v46 = vadd.f32 -0.28449672, %v1056_v42  ;;  %v1262_v20 = vsel %vm1230_vm14, %v1246_v57, %v1214_v59 }
 0x2a0   :  { %v1117_v39 = vmul.f32 %v2399_v5, %v1101_v1  ;;  %v1055_v33 = vmul.f32 %v2405_v34, %v1039_v47  ;;  %v1278_v44 = vadd.f32 1.0, %v1262_v20 }
 0x2a1   :  { %v1088_v14 = vmul.f32 %v2401_v26, %v1072_v46 }
 0x2a2   :  { %v1197_v9 = vmul.f32 %v2407_v40, %v1117_v39  ;;  %v1071_v35 = vadd.f32 -0.28449672, %v1055_v33  ;;  %v1294_v36 = vmul.f32 %v1278_v44, %v878_v60 }
 0x2a3   :  { %v1104_v28 = vadd.f32 0.2548296, %v1088_v14 }
 0x2a4   :  { %v1213_v49 = vsub.f32 1.0, %v1197_v9  ;;  %v1087_v43 = vmul.f32 %v2405_v34, %v1071_v35 }
 0x2a5   :  { %v1120_v25 = vmul.f32 %v2401_v26, %v1104_v28 }
 0x2a6   :  { %v1245_v41 = vsub.f32 0.0, %v1213_v49  ;;  %v1103_v19 = vadd.f32 0.2548296, %v1087_v43 }
 0x2a7   :  { %v1200_v45 = vmul.f32 %v2409_v8, %v1120_v25 }
 0x2a8   :  { %v1261_v50 = vsel %vm1229_vm15, %v1245_v41, %v1213_v49  ;;  %v1119_v12 = vmul.f32 %v2405_v34, %v1103_v19 }
 0x2a9   :  { %v1277_v7 = vadd.f32 1.0, %v1261_v50  ;;  %v1216_v5 = vsub.f32 1.0, %v1200_v45 }
 0x2aa   :  { %v1199_v18 = vmul.f32 %v2411_v21, %v1119_v12 }
 0x2ab   :  { %v1293_v16 = vmul.f32 %v1277_v7, %v877_v2  ;;  %v1248_v23 = vsub.f32 0.0, %v1216_v5 }
 0x2ac   :  { %v1215_v58 = vsub.f32 1.0, %v1199_v18 }
 0x2ad   :  { %2203 = vmatprep.mubr.msk.f32.mxu1 %vm671_vm1, %v1293_v16  ;;  %v1264_v62 = vsel %vm1232_vm0, %v1248_v23, %v1216_v5 }
 0x2ae   :  { %2204 = vmatmul.mubr.msk.f32.gmra.mrb[24].mxu1 %vm671_vm1, %v1294_v36  ;;  %v1247_v26 = vsub.f32 0.0, %v1215_v58  ;;  %v1280_v29 = vadd.f32 1.0, %v1264_v62 }
 0x2b0   :  { %v1263_v32 = vsel %vm1231_vm2, %v1247_v26, %v1215_v58  ;;  %v1296_v0 = vmul.f32 %v1280_v29, %v880_v51 }
 0x2b1   :  { %v1279_v48 = vadd.f32 1.0, %v1263_v32 }
 0x2b3   :  { %v1295_v11 = vmul.f32 %v1279_v48, %v879_v53 }
 0x2b5   :  { %2206 = vmatprep.mubr.msk.f32.mxu1 %vm671_vm1, %v1295_v11 }
 0x2b6   :  { %2207 = vmatmul.mubr.msk.f32.gmra.mrb[26].mxu1 %vm671_vm1, %v1296_v0 }
 0x318   :  { %v2187_v22 = vpop.f32.mrb[12].mxu1 }
 0x319   :  { %v3323_v37 = vadd.f32 %v2187_v22, %v3320_v56  ;;  %v1426_v4 = vpop.f32.mrb[13].mxu1 }
 0x31a   :  { %v3326_v38 = vadd.f32 %v3320_v56, %v1426_v4 }
 0x31b   :  { %v3329_v27 = vmul.f32 0.70710677, %v3323_v37 }
 0x31c   :  { %v3332_v10 = vmul.f32 0.70710677, %v3326_v38  ;;  %v2190_v6 = vpop.f32.mrb[14].mxu1 }
 0x31d   :  { %v1538_v34 = vand.u32 2147483647, %v3329_v27  ;;  %v3336_v13 = vadd.f32 %v2190_v6, %v3320_v56  ;;  %v1436_v17 = vpop.f32.mrb[15].mxu1  ;;  %vm1858_vm3 = vcmp.lt.f32.partialorder %v3329_v27, 0.0 }
 0x31e   :  { %v1537_v55 = vand.u32 2147483647, %v3332_v10  ;;  %v3340_v61 = vadd.f32 %v3320_v56, %v1436_v17  ;;  %vm1857_vm4 = vcmp.lt.f32.partialorder %v3332_v10, 0.0 }
 0x31f   :  { %v1554_v30 = vmul.f32 0.3275911, %v1538_v34  ;;  %v3343_v3 = vmul.f32 0.70710677, %v3336_v13  ;;  %v1762_v47 = vsub.f32 0.0, %v1538_v34 }
 0x320   :  { %v1553_v24 = vmul.f32 0.3275911, %v1537_v55  ;;  %v3346_v54 = vmul.f32 0.70710677, %v3340_v61  ;;  %v1761_v39 = vsub.f32 0.0, %v1537_v55 }
 0x321   :  { %v1570_v31 = vadd.f32 1.0, %v1554_v30  ;;  %v1540_v52 = vand.u32 2147483647, %v3343_v3  ;;  %v1778_v57 = vmul.f32 %v1762_v47, %v1538_v34  ;;  %vm1860_vm5 = vcmp.lt.f32.partialorder %v3343_v3, 0.0 }
 0x322   :  { %v1569_v63 = vadd.f32 1.0, %v1553_v24  ;;  %v1539_v59 = vand.u32 2147483647, %v3346_v54  ;;  %v1777_v28 = vmul.f32 %v1761_v39, %v1537_v55  ;;  %vm1859_vm6 = vcmp.lt.f32.partialorder %v3346_v54, 0.0 }
 0x323   :  { %2412 = vrcp.f32 %v1570_v31  ;;  %v1556_v42 = vmul.f32 0.3275911, %v1540_v52  ;;  %v1764_v14 = vsub.f32 0.0, %v1540_v52  ;;  %v1795_v43 = vmul.f32 1.442695, %v1778_v57 }
 0x324   :  { %2414 = vrcp.f32 %v1569_v63  ;;  %v1555_v15 = vmul.f32 0.3275911, %v1539_v59  ;;  %v1763_v35 = vsub.f32 0.0, %v1539_v59  ;;  %v1793_v44 = vmul.f32 1.442695, %v1777_v28 }
 0x325   :  { %v1572_v1 = vadd.f32 1.0, %v1556_v42  ;;  %v1780_v41 = vmul.f32 %v1764_v14, %v1540_v52 }
 0x326   :  { %v1571_v46 = vadd.f32 1.0, %v1555_v15  ;;  %v1779_v2 = vmul.f32 %v1763_v35, %v1539_v59 }
 0x327   :  { %2416 = vrcp.f32 %v1572_v1  ;;  %v1799_v16 = vmul.f32 1.442695, %v1780_v41 }
 0x328   :  { %2418 = vrcp.f32 %v1571_v46  ;;  %v1797_v58 = vmul.f32 1.442695, %v1779_v2 }
 0x329   :  { %2420 = vpow2.f32 %v1795_v43  ;;  %v1506_v43 = vmul.f32 0.5, %v3323_v37  ;;  %v1508_v37 = vmul.f32 0.5, %v3336_v13 }
 0x32a   :  { %2422 = vpow2.f32 %v1793_v44 }
 0x32b   :  { %2424 = vpow2.f32 %v1799_v16 }
 0x32c   :  { %2426 = vpow2.f32 %v1797_v58 }
 0x32d   :  { %v2413_v40 = vpop.eup %2412 }
 0x32e   :  { %v2415_v33 = vpop.eup %2414  ;;  %v1618_v9 = vmul.f32 1.0614054, %v2413_v40 }
 0x32f   :  { %v1617_v49 = vmul.f32 1.0614054, %v2415_v33 }
 0x330   :  { %v1634_v20 = vadd.f32 -1.4531521, %v1618_v9 }
 0x331   :  { %v2417_v25 = vpop.eup %2416  ;;  %v1633_v8 = vadd.f32 -1.4531521, %v1617_v49 }
 0x332   :  { %v2419_v45 = vpop.eup %2418  ;;  %v1650_v19 = vmul.f32 %v2413_v40, %v1634_v20  ;;  %v1620_v50 = vmul.f32 1.0614054, %v2417_v25 }
 0x333   :  { %v1649_v7 = vmul.f32 %v2415_v33, %v1633_v8  ;;  %v1619_v5 = vmul.f32 1.0614054, %v2419_v45  ;;  %v2421_v24 = vpop.eup %2420 }
 0x334   :  { %v1666_v12 = vadd.f32 1.4214138, %v1650_v19  ;;  %v1636_v21 = vadd.f32 -1.4531521, %v1620_v50  ;;  %v2423_v63 = vpop.eup %2422 }
 0x335   :  { %v1665_v60 = vadd.f32 1.4214138, %v1649_v7  ;;  %v1635_v23 = vadd.f32 -1.4531521, %v1619_v5  ;;  %v2425_v39 = vpop.eup %2424 }
 0x336   :  { %v1682_v18 = vmul.f32 %v2413_v40, %v1666_v12  ;;  %v1652_v36 = vmul.f32 %v2417_v25, %v1636_v21  ;;  %v2427_v9 = vpop.eup %2426 }
 0x337   :  { %v1681_v62 = vmul.f32 %v2415_v33, %v1665_v60  ;;  %v1651_v26 = vmul.f32 %v2419_v45, %v1635_v23 }
 0x338   :  { %v1698_v29 = vadd.f32 -0.28449672, %v1682_v18  ;;  %v1668_v32 = vadd.f32 1.4214138, %v1652_v36 }
 0x339   :  { %v1697_v53 = vadd.f32 -0.28449672, %v1681_v62  ;;  %v1667_v48 = vadd.f32 1.4214138, %v1651_v26 }
 0x33a   :  { %v1714_v51 = vmul.f32 %v2413_v40, %v1698_v29  ;;  %v1684_v11 = vmul.f32 %v2417_v25, %v1668_v32 }
 0x33b   :  { %v1713_v0 = vmul.f32 %v2415_v33, %v1697_v53  ;;  %v1683_v22 = vmul.f32 %v2419_v45, %v1667_v48 }
 0x33c   :  { %v1730_v4 = vadd.f32 0.2548296, %v1714_v51  ;;  %v1700_v6 = vadd.f32 -0.28449672, %v1684_v11 }
 0x33d   :  { %v1729_v34 = vadd.f32 0.2548296, %v1713_v0  ;;  %v1699_v17 = vadd.f32 -0.28449672, %v1683_v22 }
 0x33e   :  { %v1746_v55 = vmul.f32 %v2413_v40, %v1730_v4  ;;  %v1716_v30 = vmul.f32 %v2417_v25, %v1700_v6 }
 0x33f   :  { %v1745_v31 = vmul.f32 %v2415_v33, %v1729_v34  ;;  %v1715_v52 = vmul.f32 %v2419_v45, %v1699_v17 }
 0x340   :  { %v1826_v59 = vmul.f32 %v2421_v24, %v1746_v55  ;;  %v1732_v42 = vadd.f32 0.2548296, %v1716_v30 }
 0x341   :  { %v1825_v15 = vmul.f32 %v2423_v63, %v1745_v31  ;;  %v1731_v1 = vadd.f32 0.2548296, %v1715_v52 }
 0x342   :  { %v1842_v46 = vsub.f32 1.0, %v1826_v59  ;;  %v1748_v47 = vmul.f32 %v2417_v25, %v1732_v42  ;;  %v1505_v25 = vmul.f32 0.5, %v3326_v38  ;;  %v1507_v38 = vmul.f32 0.5, %v3340_v61 }
 0x343   :  { %v1841_v57 = vsub.f32 1.0, %v1825_v15  ;;  %v1747_v14 = vmul.f32 %v2419_v45, %v1731_v1 }
 0x344   :  { %v1874_v28 = vsub.f32 0.0, %v1842_v46  ;;  %v1828_v35 = vmul.f32 %v2425_v39, %v1748_v47 }
 0x345   :  { %v1873_v40 = vsub.f32 0.0, %v1841_v57  ;;  %v1827_v49 = vmul.f32 %v2427_v9, %v1747_v14 }
 0x346   :  { %v1890_v20 = vsel %vm1858_vm3, %v1874_v28, %v1842_v46  ;;  %v1844_v33 = vsub.f32 1.0, %v1828_v35 }
 0x347   :  { %v1906_v8 = vadd.f32 1.0, %v1890_v20  ;;  %v1889_v41 = vsel %vm1857_vm4, %v1873_v40, %v1841_v57  ;;  %v1843_v19 = vsub.f32 1.0, %v1827_v49 }
 0x348   :  { %v1905_v44 = vadd.f32 1.0, %v1889_v41  ;;  %v1876_v45 = vsub.f32 0.0, %v1844_v33 }
 0x349   :  { %v1922_v50 = vmul.f32 %v1906_v8, %v1506_v43  ;;  %v1875_v2 = vsub.f32 0.0, %v1843_v19 }
 0x34a   :  { %v1921_v27 = vmul.f32 %v1905_v44, %v1505_v25  ;;  %v1892_v7 = vsel %vm1860_vm5, %v1876_v45, %v1844_v33 }
 0x34b   :  { %1938 = vst.msk [vmem:[%s3597_s7 + $0x8] sm:$0xff] %vm671_vm1, %v1922_v50  ;;  %v1908_v10 = vadd.f32 1.0, %v1892_v7  ;;  %v1891_v5 = vsel %vm1859_vm6, %v1875_v2, %v1843_v19 }
 0x34c   :  { %1937 = vst.msk [vmem:[%s3597_s7] sm:$0xff] %vm671_vm1, %v1921_v27  ;;  %v1907_v3 = vadd.f32 1.0, %v1891_v5 }
 0x34d   :  { %v1924_v12 = vmul.f32 %v1908_v10, %v1508_v37 }
 0x34e   :  { %v1923_v21 = vmul.f32 %v1907_v3, %v1507_v38 }
 0x34f   :  { %1940 = vst.msk [vmem:[%s3597_s7 + $0x18] sm:$0xff] %vm671_vm1, %v1924_v12 }
 0x350   :  { %1939 = vst.msk [vmem:[%s3597_s7 + $0x10] sm:$0xff] %vm671_vm1, %v1923_v21  ;;  %v2193_v13 = vpop.f32.mrb[16].mxu1 }
 0x351   :  { %v1452_v54 = vadd.f32 %v2193_v13, %v3320_v56  ;;  %v1446_v60 = vpop.f32.mrb[17].mxu1 }
 0x352   :  { %v1447_v16 = vadd.f32 %v3320_v56, %v1446_v60 }
 0x353   :  { %v3376_v61 = vmul.f32 0.70710677, %v1452_v54  ;;  %v3404_v28 = vmul.f32 0.5, %v1452_v54 }
 0x354   :  { %v3378_v23 = vmul.f32 0.70710677, %v1447_v16  ;;  %v2196_v18 = vpop.f32.mrb[18].mxu1  ;;  %v3406_v40 = vmul.f32 0.5, %v1447_v16 }
 0x355   :  { %v1542_v36 = vand.u32 2147483647, %v3376_v61  ;;  %v1462_v58 = vadd.f32 %v2196_v18, %v3320_v56  ;;  %v1456_v62 = vpop.f32.mrb[19].mxu1  ;;  %vm1862_vm7 = vcmp.lt.f32.partialorder %v3376_v61, 0.0 }
 0x356   :  { %v1541_v26 = vand.u32 2147483647, %v3378_v23  ;;  %v1457_v29 = vadd.f32 %v3320_v56, %v1456_v62  ;;  %vm1861_vm8 = vcmp.lt.f32.partialorder %v3378_v23, 0.0 }
 0x357   :  { %v1558_v32 = vmul.f32 0.3275911, %v1542_v36  ;;  %v3384_v53 = vmul.f32 0.70710677, %v1462_v58  ;;  %v1766_v0 = vsub.f32 0.0, %v1542_v36  ;;  %v3408_v49 = vmul.f32 0.5, %v1462_v58 }
 0x358   :  { %v1557_v48 = vmul.f32 0.3275911, %v1541_v26  ;;  %v3386_v51 = vmul.f32 0.70710677, %v1457_v29  ;;  %v1765_v24 = vsub.f32 0.0, %v1541_v26  ;;  %v3422_v10 = vmul.f32 0.5, %v1457_v29 }
 0x359   :  { %v1574_v11 = vadd.f32 1.0, %v1558_v32  ;;  %v1544_v22 = vand.u32 2147483647, %v3384_v53  ;;  %v1782_v30 = vmul.f32 %v1766_v0, %v1542_v36  ;;  %vm1864_vm9 = vcmp.lt.f32.partialorder %v3384_v53, 0.0 }
 0x35a   :  { %v1573_v4 = vadd.f32 1.0, %v1557_v48  ;;  %v1543_v6 = vand.u32 2147483647, %v3386_v51  ;;  %v2199_v55 = vpop.f32.mrb[20].mxu1  ;;  %v1781_v39 = vmul.f32 %v1765_v24, %v1541_v26  ;;  %vm1863_vm10 = vcmp.lt.f32.partialorder %v3386_v51, 0.0 }
 0x35b   :  { %2428 = vrcp.f32 %v1574_v11  ;;  %v1560_v34 = vmul.f32 0.3275911, %v1544_v22  ;;  %v3391_v52 = vadd.f32 %v2199_v55, %v3320_v56  ;;  %v1466_v63 = vpop.f32.mrb[21].mxu1  ;;  %v1768_v1 = vsub.f32 0.0, %v1544_v22 }
 0x35c   :  { %2430 = vrcp.f32 %v1573_v4  ;;  %v1559_v17 = vmul.f32 0.3275911, %v1543_v6  ;;  %v3394_v42 = vadd.f32 %v3320_v56, %v1466_v63  ;;  %v1803_v47 = vmul.f32 1.442695, %v1782_v30 }
 0x35d   :  { %v1576_v31 = vadd.f32 1.0, %v1560_v34  ;;  %v3397_v15 = vmul.f32 0.70710677, %v3391_v52  ;;  %v1767_v14 = vsub.f32 0.0, %v1543_v6  ;;  %v1784_v20 = vmul.f32 %v1768_v1, %v1544_v22 }
 0x35e   :  { %v1575_v59 = vadd.f32 1.0, %v1559_v17  ;;  %v3400_v46 = vmul.f32 0.70710677, %v3394_v42  ;;  %v1801_v41 = vmul.f32 1.442695, %v1781_v39 }
 0x35f   :  { %2432 = vrcp.f32 %v1576_v31  ;;  %v1546_v57 = vand.u32 2147483647, %v3397_v15  ;;  %v1783_v2 = vmul.f32 %v1767_v14, %v1543_v6  ;;  %v1807_v3 = vmul.f32 1.442695, %v1784_v20 }
 0x360   :  { %2434 = vrcp.f32 %v1575_v59  ;;  %v1545_v9 = vand.u32 2147483647, %v3400_v46  ;;  %vm1866_vm11 = vcmp.lt.f32.partialorder %v3397_v15, 0.0  ;;  %vm1865_vm12 = vcmp.lt.f32.partialorder %v3400_v46, 0.0 }
 0x361   :  { %v1562_v35 = vmul.f32 0.3275911, %v1546_v57  ;;  %2436 = vpow2.f32 %v1803_v47  ;;  %v1770_v5 = vsub.f32 0.0, %v1546_v57  ;;  %v1805_v58 = vmul.f32 1.442695, %v1783_v2 }
 0x362   :  { %v1561_v33 = vmul.f32 0.3275911, %v1545_v9  ;;  %v2202_v43 = vpop.f32.mrb[22].mxu1  ;;  %v1769_v54 = vsub.f32 0.0, %v1545_v9 }
 0x363   :  { %v1578_v19 = vadd.f32 1.0, %v1562_v35  ;;  %v3413_v25 = vadd.f32 %v2202_v43, %v3320_v56  ;;  %v1476_v44 = vpop.f32.mrb[23].mxu1  ;;  %v1786_v32 = vmul.f32 %v1770_v5, %v1546_v57 }
 0x364   :  { %v1577_v27 = vadd.f32 1.0, %v1561_v33  ;;  %v3419_v7 = vadd.f32 %v3320_v56, %v1476_v44  ;;  %v1785_v34 = vmul.f32 %v1769_v54, %v1545_v9 }
 0x365   :  { %v3410_v8 = vpop.eup %2428  ;;  %2438 = vrcp.f32 %v1578_v19  ;;  %v3425_v12 = vmul.f32 0.70710677, %v3413_v25  ;;  %v1811_v47 = vmul.f32 1.442695, %v1786_v32 }
 0x366   :  { %v3415_v45 = vpop.eup %2430  ;;  %v1622_v50 = vmul.f32 1.0614054, %v3410_v8  ;;  %2440 = vrcp.f32 %v1577_v27  ;;  %v3430_v60 = vmul.f32 0.70710677, %v3419_v7  ;;  %v1809_v33 = vmul.f32 1.442695, %v1785_v34 }
 0x367   :  { %v1621_v37 = vmul.f32 1.0614054, %v3415_v45  ;;  %2442 = vpow2.f32 %v1801_v41  ;;  %v1548_v62 = vand.u32 2147483647, %v3425_v12  ;;  %vm1868_vm13 = vcmp.lt.f32.partialorder %v3425_v12, 0.0 }
 0x368   :  { %v1638_v38 = vadd.f32 -1.4531521, %v1622_v50  ;;  %v1547_v48 = vand.u32 2147483647, %v3430_v60  ;;  %2444 = vpow2.f32 %v1807_v3  ;;  %vm1867_vm14 = vcmp.lt.f32.partialorder %v3430_v60, 0.0 }
 0x369   :  { %v3427_v21 = vpop.eup %2432  ;;  %v1637_v13 = vadd.f32 -1.4531521, %v1621_v37  ;;  %v1564_v22 = vmul.f32 0.3275911, %v1548_v62  ;;  %v1772_v17 = vsub.f32 0.0, %v1548_v62  ;;  %2446 = vpow2.f32 %v1805_v58 }
 0x36a   :  { %v3432_v16 = vpop.eup %2434  ;;  %v1654_v18 = vmul.f32 %v3410_v8, %v1638_v38  ;;  %v1624_v36 = vmul.f32 1.0614054, %v3427_v21  ;;  %v1563_v31 = vmul.f32 0.3275911, %v1547_v48  ;;  %v1771_v38 = vsub.f32 0.0, %v1547_v48 }
 0x36b   :  { %v1653_v26 = vmul.f32 %v3415_v45, %v1637_v13  ;;  %v1623_v29 = vmul.f32 1.0614054, %v3432_v16  ;;  %v1580_v24 = vadd.f32 1.0, %v1564_v22  ;;  %v2437_v63 = vpop.eup %2436  ;;  %v1788_v43 = vmul.f32 %v1772_v17, %v1548_v62 }
 0x36c   :  { %v1670_v11 = vadd.f32 1.4214138, %v1654_v18  ;;  %v1640_v0 = vadd.f32 -1.4531521, %v1624_v36  ;;  %v1579_v14 = vadd.f32 1.0, %v1563_v31  ;;  %v1515_v12 = vmul.f32 0.5, %v3419_v7 }
 0x36d   :  { %v1669_v4 = vadd.f32 1.4214138, %v1653_v26  ;;  %v1639_v6 = vadd.f32 -1.4531521, %v1623_v29  ;;  %2448 = vrcp.f32 %v1580_v24 }
 0x36e   :  { %v1686_v55 = vmul.f32 %v3410_v8, %v1670_v11  ;;  %v1656_v30 = vmul.f32 %v3427_v21, %v1640_v0  ;;  %2450 = vrcp.f32 %v1579_v14  ;;  %v1815_v11 = vmul.f32 1.442695, %v1788_v43 }
 0x36f   :  { %v1685_v59 = vmul.f32 %v3415_v45, %v1669_v4  ;;  %v1655_v1 = vmul.f32 %v3432_v16, %v1639_v6  ;;  %v3444_v35 = vpop.eup %2438  ;;  %2452 = vpow2.f32 %v1811_v47 }
 0x370   :  { %v1702_v39 = vadd.f32 -0.28449672, %v1686_v55  ;;  %v1672_v57 = vadd.f32 1.4214138, %v1656_v30  ;;  %v3446_v41 = vpop.eup %2440  ;;  %v1626_v50 = vmul.f32 1.0614054, %v3444_v35  ;;  %v1787_v55 = vmul.f32 %v1771_v38, %v1547_v48 }
 0x371   :  { %v1701_v9 = vadd.f32 -0.28449672, %v1685_v59  ;;  %v1671_v20 = vadd.f32 1.4214138, %v1655_v1  ;;  %v2443_v2 = vpop.eup %2442  ;;  %v1625_v5 = vmul.f32 1.0614054, %v3446_v41  ;;  %2454 = vpow2.f32 %v1809_v33 }
 0x372   :  { %v1718_v19 = vmul.f32 %v3410_v8, %v1702_v39  ;;  %v1688_v44 = vmul.f32 %v3427_v21, %v1672_v57  ;;  %v1642_v54 = vadd.f32 -1.4531521, %v1626_v50  ;;  %v2445_v62 = vpop.eup %2444  ;;  %2456 = vpow2.f32 %v1815_v11 }
 0x373   :  { %v1717_v27 = vmul.f32 %v3415_v45, %v1701_v9  ;;  %v1687_v37 = vmul.f32 %v3432_v16, %v1671_v20  ;;  %v1641_v58 = vadd.f32 -1.4531521, %v1625_v5  ;;  %v2447_v30 = vpop.eup %2446  ;;  %v1813_v43 = vmul.f32 1.442695, %v1787_v55 }
 0x374   :  { %v1734_v3 = vadd.f32 0.2548296, %v1718_v19  ;;  %v1704_v13 = vadd.f32 -0.28449672, %v1688_v44  ;;  %v1658_v32 = vmul.f32 %v3444_v35, %v1642_v54 }
 0x375   :  { %v1733_v18 = vadd.f32 0.2548296, %v1717_v27  ;;  %v1703_v36 = vadd.f32 -0.28449672, %v1687_v37  ;;  %v1657_v4 = vmul.f32 %v3446_v41, %v1641_v58  ;;  %2458 = vpow2.f32 %v1813_v43 }
 0x376   :  { %v1750_v26 = vmul.f32 %v3410_v8, %v1734_v3  ;;  %v1720_v29 = vmul.f32 %v3427_v21, %v1704_v13  ;;  %v1674_v17 = vadd.f32 1.4214138, %v1658_v32 }
 0x377   :  { %v1749_v0 = vmul.f32 %v3415_v45, %v1733_v18  ;;  %v1719_v22 = vmul.f32 %v3432_v16, %v1703_v36  ;;  %v1673_v31 = vadd.f32 1.4214138, %v1657_v4  ;;  %v3463_v59 = vpop.eup %2448 }
 0x378   :  { %v1830_v6 = vmul.f32 %v2437_v63, %v1750_v26  ;;  %v1736_v34 = vadd.f32 0.2548296, %v1720_v29  ;;  %v1690_v47 = vmul.f32 %v3444_v35, %v1674_v17  ;;  %v1628_v57 = vmul.f32 1.0614054, %v3463_v59  ;;  %v3471_v14 = vpop.eup %2450 }
 0x379   :  { %v1829_v8 = vmul.f32 %v2443_v2, %v1749_v0  ;;  %v1735_v24 = vadd.f32 0.2548296, %v1719_v22  ;;  %v1689_v39 = vmul.f32 %v3446_v41, %v1673_v31  ;;  %v1627_v37 = vmul.f32 1.0614054, %v3471_v14 }
 0x37a   :  { %v1846_v1 = vsub.f32 1.0, %v1830_v6  ;;  %v1752_v45 = vmul.f32 %v3427_v21, %v1736_v34  ;;  %v1706_v33 = vadd.f32 -0.28449672, %v1690_v47  ;;  %v1644_v50 = vadd.f32 -1.4531521, %v1628_v57 }
 0x37b   :  { %v1845_v63 = vsub.f32 1.0, %v1829_v8  ;;  %v1751_v48 = vmul.f32 %v3432_v16, %v1735_v24  ;;  %v1705_v44 = vadd.f32 -0.28449672, %v1689_v39  ;;  %v1643_v32 = vadd.f32 -1.4531521, %v1627_v37 }
 0x37c   :  { %v1878_v9 = vsub.f32 0.0, %v1846_v1  ;;  %v1832_v20 = vmul.f32 %v2445_v62, %v1752_v45  ;;  %v1722_v16 = vmul.f32 %v3444_v35, %v1706_v33  ;;  %v1660_v58 = vmul.f32 %v3463_v59, %v1644_v50  ;;  %v2453_v62 = vpop.eup %2452 }
 0x37d   :  { %v1877_v19 = vsub.f32 0.0, %v1845_v63  ;;  %v1831_v21 = vmul.f32 %v2447_v30, %v1751_v48  ;;  %v1721_v13 = vmul.f32 %v3446_v41, %v1705_v44  ;;  %v2455_v4 = vpop.eup %2454  ;;  %v1513_v37 = vmul.f32 0.5, %v3394_v42 }
 0x37e   :  { %v1894_v2 = vsel %vm1862_vm7, %v1878_v9, %v1846_v1  ;;  %v1848_v27 = vsub.f32 1.0, %v1832_v20  ;;  %v1738_v36 = vadd.f32 0.2548296, %v1722_v16  ;;  %v1676_v22 = vadd.f32 1.4214138, %v1660_v58  ;;  %v2457_v17 = vpop.eup %2456 }
 0x37f   :  { %v1910_v5 = vadd.f32 1.0, %v1894_v2  ;;  %v1893_v38 = vsel %vm1861_vm8, %v1877_v19, %v1845_v63  ;;  %v1847_v3 = vsub.f32 1.0, %v1831_v21  ;;  %v1737_v29 = vadd.f32 0.2548296, %v1721_v13 }
 0x380   :  { %v1909_v54 = vadd.f32 1.0, %v1893_v38  ;;  %v1880_v18 = vsub.f32 0.0, %v1848_v27  ;;  %v1754_v0 = vmul.f32 %v3444_v35, %v1738_v36  ;;  %v1692_v55 = vmul.f32 %v3463_v59, %v1676_v22  ;;  %v2459_v36 = vpop.eup %2458 }
 0x381   :  { %v1926_v61 = vmul.f32 %v1910_v5, %v3404_v28  ;;  %v1879_v26 = vsub.f32 0.0, %v1847_v3  ;;  %v1753_v34 = vmul.f32 %v3446_v41, %v1737_v29  ;;  %v2205_v30 = vpop.f32.mrb[24].mxu1 }
 0x382   :  { %v1925_v11 = vmul.f32 %v1909_v54, %v3406_v40  ;;  %v1896_v23 = vsel %vm1864_vm9, %v1880_v18, %v1848_v27  ;;  %v1659_v40 = vmul.f32 %v3471_v14, %v1643_v32  ;;  %v1834_v35 = vmul.f32 %v2453_v62, %v1754_v0  ;;  %v1486_v31 = vpop.f32.mrb[25].mxu1 }
 0x383   :  { %1942 = vst.msk [vmem:[%s3597_s7 + $0x28] sm:$0xff] %vm671_vm1, %v1926_v61  ;;  %v1912_v6 = vadd.f32 1.0, %v1896_v23  ;;  %v1895_v28 = vsel %vm1863_vm10, %v1879_v26, %v1847_v3  ;;  %v1833_v51 = vmul.f32 %v2455_v4, %v1753_v34  ;;  %v3501_v41 = vadd.f32 %v2205_v30, %v3320_v56 }
 0x384   :  { %1941 = vst.msk [vmem:[%s3597_s7 + $0x20] sm:$0xff] %vm671_vm1, %v1925_v11  ;;  %v1911_v53 = vadd.f32 1.0, %v1895_v28  ;;  %v1675_v24 = vadd.f32 1.4214138, %v1659_v40  ;;  %v1850_v45 = vsub.f32 1.0, %v1834_v35  ;;  %v3505_v63 = vadd.f32 %v3320_v56, %v1486_v31 }
 0x385   :  { %v1928_v8 = vmul.f32 %v1912_v6, %v3408_v49  ;;  %v1708_v47 = vadd.f32 -0.28449672, %v1692_v55  ;;  %v1849_v48 = vsub.f32 1.0, %v1833_v51  ;;  %v3513_v39 = vmul.f32 0.70710677, %v3501_v41 }
 0x386   :  { %v1927_v1 = vmul.f32 %v1911_v53, %v3422_v10  ;;  %v1691_v49 = vmul.f32 %v3471_v14, %v1675_v24  ;;  %v1514_v10 = vmul.f32 0.5, %v3391_v52  ;;  %v1882_v57 = vsub.f32 0.0, %v1850_v45 }
 0x387   :  { %1944 = vst.msk [vmem:[%s3597_s7 + $0x38] sm:$0xff] %vm671_vm1, %v1928_v8  ;;  %v1724_v9 = vmul.f32 %v3463_v59, %v1708_v47  ;;  %v3522_v20 = vmul.f32 0.70710677, %v3505_v63  ;;  %v1881_v33 = vsub.f32 0.0, %v1849_v48  ;;  %v1550_v19 = vand.u32 2147483647, %v3513_v39 }
 0x388   :  { %1943 = vst.msk [vmem:[%s3597_s7 + $0x30] sm:$0xff] %vm671_vm1, %v1927_v1  ;;  %v1707_v43 = vadd.f32 -0.28449672, %v1691_v49  ;;  %v1898_v21 = vsel %vm1866_vm11, %v1882_v57, %v1850_v45  ;;  %v1516_v4 = vmul.f32 0.5, %v3413_v25  ;;  %vm1870_vm15 = vcmp.lt.f32.partialorder %v3513_v39, 0.0 }
 0x389   :  { %v1740_v44 = vadd.f32 0.2548296, %v1724_v9  ;;  %v1549_v50 = vand.u32 2147483647, %v3522_v20  ;;  %v1914_v2 = vadd.f32 1.0, %v1898_v21  ;;  %v1897_v52 = vsel %vm1865_vm12, %v1881_v33, %v1849_v48  ;;  %v2208_v18 = vpop.f32.mrb[26].mxu1 }
 0x38a   :  { %v1723_v27 = vmul.f32 %v3471_v14, %v1707_v43  ;;  %v1566_v16 = vmul.f32 0.3275911, %v1550_v19  ;;  %v1913_v5 = vadd.f32 1.0, %v1897_v52  ;;  %v1496_v61 = vpop.f32.mrb[27].mxu1  ;;  %v1774_v40 = vsub.f32 0.0, %v1550_v19 }
 0x38b   :  { %v1756_v15 = vmul.f32 %v3463_v59, %v1740_v44  ;;  %v1565_v38 = vmul.f32 0.3275911, %v1549_v50  ;;  %v1930_v3 = vmul.f32 %v1914_v2, %v1514_v10  ;;  %v3537_v59 = vadd.f32 %v2208_v18, %v3320_v56 }
 0x38c   :  { %v1739_v13 = vadd.f32 0.2548296, %v1723_v27  ;;  %v1582_v54 = vadd.f32 1.0, %v1566_v16  ;;  %v1929_v46 = vmul.f32 %v1913_v5, %v1513_v37  ;;  %v3544_v29 = vadd.f32 %v3320_v56, %v1496_v61 }
 0x38d   :  { %v1836_v58 = vmul.f32 %v2457_v17, %v1756_v15  ;;  %v1581_v62 = vadd.f32 1.0, %v1565_v38  ;;  %1946 = vst.msk [vmem:[%s3597_s7 + $0x48] sm:$0xff] %vm671_vm1, %v1930_v3  ;;  %v3547_v11 = vmul.f32 0.70710677, %v3537_v59  ;;  %v1773_v53 = vsub.f32 0.0, %v1549_v50 }
 0x38e   :  { %v1755_v42 = vmul.f32 %v3471_v14, %v1739_v13  ;;  %2460 = vrcp.f32 %v1582_v54  ;;  %1945 = vst.msk [vmem:[%s3597_s7 + $0x40] sm:$0xff] %vm671_vm1, %v1929_v46  ;;  %v3550_v14 = vmul.f32 0.70710677, %v3544_v29  ;;  %v1790_v25 = vmul.f32 %v1774_v40, %v1550_v19 }
 0x38f   :  { %v1852_v26 = vsub.f32 1.0, %v1836_v58  ;;  %2462 = vrcp.f32 %v1581_v62  ;;  %v1552_v22 = vand.u32 2147483647, %v3547_v11  ;;  %v1789_v47 = vmul.f32 %v1773_v53, %v1549_v50 }
 0x390   :  { %v1835_v32 = vmul.f32 %v2459_v36, %v1755_v42  ;;  %v1551_v28 = vand.u32 2147483647, %v3550_v14  ;;  %v1819_v49 = vmul.f32 1.442695, %v1790_v25  ;;  %vm1869_vm0 = vcmp.lt.f32.partialorder %v3522_v20, 0.0 }
 0x391   :  { %v1884_v23 = vsub.f32 0.0, %v1852_v26  ;;  %v1568_v17 = vmul.f32 0.3275911, %v1552_v22  ;;  %v1817_v9 = vmul.f32 1.442695, %v1789_v47  ;;  %v1776_v43 = vsub.f32 0.0, %v1552_v22 }
 0x392   :  { %v1851_v0 = vsub.f32 1.0, %v1835_v32  ;;  %v1567_v35 = vmul.f32 0.3275911, %v1551_v28  ;;  %v1775_v21 = vsub.f32 0.0, %v1551_v28  ;;  %v1518_v25 = vmul.f32 0.5, %v3501_v41 }
 0x393   :  { %v1900_v6 = vsel %vm1868_vm13, %v1884_v23, %v1852_v26  ;;  %v1584_v8 = vadd.f32 1.0, %v1568_v17  ;;  %v1792_v27 = vmul.f32 %v1776_v43, %v1552_v22  ;;  %v1517_v47 = vmul.f32 0.5, %v3505_v63 }
 0x394   :  { %v1916_v56 = vadd.f32 1.0, %v1900_v6  ;;  %v1883_v34 = vsub.f32 0.0, %v1851_v0  ;;  %v1583_v24 = vadd.f32 1.0, %v1567_v35  ;;  %v1791_v15 = vmul.f32 %v1775_v21, %v1551_v28 }
 0x395   :  { %2464 = vrcp.f32 %v1584_v8  ;;  %v1823_v36 = vmul.f32 1.442695, %v1792_v27  ;;  %vm1872_vm2 = vcmp.lt.f32.partialorder %v3547_v11, 0.0  ;;  %vm1871_vm3 = vcmp.lt.f32.partialorder %v3550_v14, 0.0 }
 0x396   :  { %v1932_v55 = vmul.f32 %v1916_v56, %v1516_v4  ;;  %v1899_v30 = vsel %vm1867_vm14, %v1883_v34, %v1851_v0  ;;  %2466 = vrcp.f32 %v1583_v24  ;;  %v1821_v61 = vmul.f32 1.442695, %v1791_v15 }
 0x397   :  { %v1915_v51 = vadd.f32 1.0, %v1899_v30  ;;  %2468 = vpow2.f32 %v1819_v49 }
 0x398   :  { %v2461_v31 = vpop.eup %2460  ;;  %1948 = vst.msk [vmem:[%s3597_s7 + $0x58] sm:$0xff] %vm671_vm1, %v1932_v55  ;;  %2470 = vpow2.f32 %v1817_v9 }
 0x399   :  { %v2463_v1 = vpop.eup %2462  ;;  %v1931_v45 = vmul.f32 %v1915_v51, %v1515_v12  ;;  %v1630_v60 = vmul.f32 1.0614054, %v2461_v31  ;;  %2472 = vpow2.f32 %v1823_v36 }
 0x39a   :  { %v1629_v48 = vmul.f32 1.0614054, %v2463_v1  ;;  %2474 = vpow2.f32 %v1821_v61 }
 0x39b   :  { %1947 = vst.msk [vmem:[%s3597_s7 + $0x50] sm:$0xff] %vm671_vm1, %v1931_v45  ;;  %v1646_v7 = vadd.f32 -1.4531521, %v1630_v60 }
 0x39c   :  { %v1645_v10 = vadd.f32 -1.4531521, %v1629_v48 }
 0x39d   :  { %v1662_v57 = vmul.f32 %v2461_v31, %v1646_v7 }
 0x39e   :  { %v1661_v33 = vmul.f32 %v2463_v1, %v1645_v10 }
 0x39f   :  { %v1678_v19 = vadd.f32 1.4214138, %v1662_v57  ;;  %v2465_v50 = vpop.eup %2464 }
 0x3a0   :  { %v1677_v44 = vadd.f32 1.4214138, %v1661_v33  ;;  %v2467_v16 = vpop.eup %2466  ;;  %v1632_v5 = vmul.f32 1.0614054, %v2465_v50 }
 0x3a1   :  { %v1694_v2 = vmul.f32 %v2461_v31, %v1678_v19  ;;  %v1631_v3 = vmul.f32 1.0614054, %v2467_v16  ;;  %v2469_v0 = vpop.eup %2468 }
 0x3a2   :  { %v1693_v52 = vmul.f32 %v2463_v1, %v1677_v44  ;;  %v1648_v54 = vadd.f32 -1.4531521, %v1632_v5  ;;  %v2471_v6 = vpop.eup %2470  ;;  %v1520_v44 = vmul.f32 0.5, %v3537_v59 }
 0x3a3   :  { %v1710_v37 = vadd.f32 -0.28449672, %v1694_v2  ;;  %v1647_v46 = vadd.f32 -1.4531521, %v1631_v3  ;;  %v2473_v49 = vpop.eup %2472 }
 0x3a4   :  { %v1709_v38 = vadd.f32 -0.28449672, %v1693_v52  ;;  %v1664_v62 = vmul.f32 %v2465_v50, %v1648_v54  ;;  %v2475_v9 = vpop.eup %2474  ;;  %v1519_v52 = vmul.f32 0.5, %v3544_v29 }
 0x3a5   :  { %v1726_v13 = vmul.f32 %v2461_v31, %v1710_v37  ;;  %v1663_v26 = vmul.f32 %v2467_v16, %v1647_v46 }
 0x3a6   :  { %v1725_v18 = vmul.f32 %v2463_v1, %v1709_v38  ;;  %v1680_v23 = vadd.f32 1.4214138, %v1664_v62 }
 0x3a7   :  { %v1742_v58 = vadd.f32 0.2548296, %v1726_v13  ;;  %v1679_v4 = vadd.f32 1.4214138, %v1663_v26 }
 0x3a8   :  { %v1741_v42 = vadd.f32 0.2548296, %v1725_v18  ;;  %v1696_v56 = vmul.f32 %v2465_v50, %v1680_v23 }
 0x3a9   :  { %v1758_v32 = vmul.f32 %v2461_v31, %v1742_v58  ;;  %v1695_v40 = vmul.f32 %v2467_v16, %v1679_v4 }
 0x3aa   :  { %v1757_v22 = vmul.f32 %v2463_v1, %v1741_v42  ;;  %v1712_v53 = vadd.f32 -0.28449672, %v1696_v56 }
 0x3ab   :  { %v1838_v28 = vmul.f32 %v2469_v0, %v1758_v32  ;;  %v1711_v55 = vadd.f32 -0.28449672, %v1695_v40 }
 0x3ac   :  { %v1837_v34 = vmul.f32 %v2471_v6, %v1757_v22  ;;  %v1728_v8 = vmul.f32 %v2465_v50, %v1712_v53 }
 0x3ad   :  { %v1854_v17 = vsub.f32 1.0, %v1838_v28  ;;  %v1727_v51 = vmul.f32 %v2467_v16, %v1711_v55 }
 0x3ae   :  { %v1853_v35 = vsub.f32 1.0, %v1837_v34  ;;  %v1744_v31 = vadd.f32 0.2548296, %v1728_v8 }
 0x3af   :  { %v1886_v30 = vsub.f32 0.0, %v1854_v17  ;;  %v1743_v60 = vadd.f32 0.2548296, %v1727_v51 }
 0x3b0   :  { %v1885_v12 = vsub.f32 0.0, %v1853_v35  ;;  %v1760_v7 = vmul.f32 %v2465_v50, %v1744_v31 }
 0x3b1   :  { %v1902_v24 = vsel %vm1870_vm15, %v1886_v30, %v1854_v17  ;;  %v1759_v57 = vmul.f32 %v2467_v16, %v1743_v60 }
 0x3b2   :  { %v1918_v1 = vadd.f32 1.0, %v1902_v24  ;;  %v1901_v45 = vsel %vm1869_vm0, %v1885_v12, %v1853_v35  ;;  %v1840_v33 = vmul.f32 %v2473_v49, %v1760_v7 }
 0x3b3   :  { %v1917_v48 = vadd.f32 1.0, %v1901_v45  ;;  %v1839_v20 = vmul.f32 %v2475_v9, %v1759_v57 }
 0x3b4   :  { %v1934_v10 = vmul.f32 %v1918_v1, %v1518_v25  ;;  %v1856_v41 = vsub.f32 1.0, %v1840_v33 }
 0x3b5   :  { %v1933_v39 = vmul.f32 %v1917_v48, %v1517_v47  ;;  %v1855_v63 = vsub.f32 1.0, %v1839_v20 }
 0x3b6   :  { %1950 = vst.msk [vmem:[%s3597_s7 + $0x68] sm:$0xff] %vm671_vm1, %v1934_v10  ;;  %v1888_v43 = vsub.f32 0.0, %v1856_v41 }
 0x3b7   :  { %1949 = vst.msk [vmem:[%s3597_s7 + $0x60] sm:$0xff] %vm671_vm1, %v1933_v39  ;;  %v1887_v19 = vsub.f32 0.0, %v1855_v63 }
 0x3b8   :  { %v1904_v21 = vsel %vm1872_vm2, %v1888_v43, %v1856_v41 }
 0x3b9   :  { %v1920_v2 = vadd.f32 1.0, %v1904_v21  ;;  %v1903_v50 = vsel %vm1871_vm3, %v1887_v19, %v1855_v63 }
 0x3ba   :  { %v1919_v27 = vadd.f32 1.0, %v1903_v50 }
 0x3bb   :  { %v1936_v16 = vmul.f32 %v1920_v2, %v1520_v44 }
 0x3bc   :  { %v1935_v37 = vmul.f32 %v1919_v27, %v1519_v52 }
 0x3bd   :  { %1952 = vst.msk [vmem:[%s3597_s7 + $0x78] sm:$0xff] %vm671_vm1, %v1936_v16 }
 0x3be   :  { %1951 = vst.msk [vmem:[%s3597_s7 + $0x70] sm:$0xff] %vm671_vm1, %v1935_v37 }
 0x3bf   :  { %1957 = vsyncpa [#allocation3], 1 }

</bundles_post_ra>
